<compile_context>
chip_gen: v7x
topology: tpu7x:2x2x1
jax: 0.10.0
libtpu: 0.0.40
codegen_flags: <defaults>
</compile_context>

<pallas_src>
import numpy as np
import jax
import jax.numpy as jnp
from jax.experimental import pallas as pl
from jax.experimental.pallas import tpu as pltpu


# ---------------------------------------------------------------------------
# Helpers
# ---------------------------------------------------------------------------

def _round_up(x, m):
    return ((x + m - 1) // m) * m


def _pick_tiles(M, P, Q):
    """Per-generation tile targets (fill VMEM; stay <= ~48 MiB on v7x)."""
    try:
        kind = jax.devices()[0].device_kind.lower()
    except Exception:
        kind = ""
    if "v6" in kind:          # v6e: 128 MiB VMEM, 256x256 MXU -> biggest tiles
        tm_t, tn_t, tk_t = 512, 512, 1024
    elif "v5" in kind:        # v5e: lowest HBM BW, small scoped-VMEM default
        tm_t, tn_t, tk_t = 256, 256, 512
    else:                     # v7x (64 MiB VMEM) / unknown: safe, review-suggested point
        tm_t, tn_t, tk_t = 256, 512, 512
    tm = min(tm_t, _round_up(M, 8))     # sublane dim: multiple of 8
    tk = min(tk_t, _round_up(P, 128))   # lane dims: multiples of 128
    tn = min(tn_t, _round_up(Q, 128))
    return tm, tn, tk


def _pad2d(x, rows, cols):
    pr = rows - x.shape[0]
    pc = cols - x.shape[1]
    if pr == 0 and pc == 0:
        return x
    return jnp.pad(x, ((0, pr), (0, pc)))


# ---------------------------------------------------------------------------
# Fused Pallas kernel:  weights matmul + bias matvec in a single HBM pass
# ---------------------------------------------------------------------------

def _backsub_fused_kernel(ubw_ref, lbw_ref, w_ref, b_ref, ubb_ref, lbb_ref,
                          uw_out, lw_out, ubb_out, lbb_out):
    j = pl.program_id(1)
    k = pl.program_id(2)

    # f32 output blocks double as the accumulators (resident across k since
    # their index_map ignores k) -> no VMEM scratch, no epilogue copy.
    @pl.when(k == 0)
    def _():
        uw_out[...] = jnp.zeros_like(uw_out)
        lw_out[...] = jnp.zeros_like(lw_out)

    ubw = ubw_ref[...]
    lbw = lbw_ref[...]
    w_tile = w_ref[...]                                    # shared by both dots
    uw_out[...] += jnp.dot(ubw, w_tile, preferred_element_type=jnp.float32)
    lw_out[...] += jnp.dot(lbw, w_tile, preferred_element_type=jnp.float32)

    # Fused bias mat-vec: only on the j == 0 pass, reusing the UBW/LBW tiles
    # already in VMEM.  VPU multiply + XLU row-reduction -> no second HBM pass,
    # no 1-lane MXU use, no narrow-output kernel.
    @pl.when((j == 0) & (k == 0))
    def _():
        ubb_out[...] = ubb_ref[...]
        lbb_out[...] = lbb_ref[...]

    @pl.when(j == 0)
    def _():
        b_row = b_ref[...]                                 # (1, tk)
        ubb_out[...] += jnp.sum(ubw * b_row, axis=1, keepdims=True)
        lbb_out[...] += jnp.sum(lbw * b_row, axis=1, keepdims=True)


def backsubstitute_affine(ubw, lbw, w, b, ub_bias, lb_bias):
    """One fused Pallas pass computing
         new_ub_bias = ub_bias + UBW @ b ,  new_lb_bias = lb_bias + LBW @ b ,
         new_UBW     = UBW @ W ,            new_LBW     = LBW @ W .
    """
    M, P = ubw.shape
    Pw, Q = w.shape
    assert P == Pw, "shape mismatch between back-bounds and layer weights"

    f32 = jnp.float32
    tm, tn, tk = _pick_tiles(M, P, Q)
    Mp, Pp, Qp = _round_up(M, tm), _round_up(P, tk), _round_up(Q, tn)

    # TODO(synk): cast UBW/LBW/W to bf16 (keep f32 MXU accumulation) when the
    # verification tolerance allows -- halves HBM traffic and VMEM per tile.

    # Zero-pad to tile multiples (zeros are neutral for the matmul / matvec).
    ubw_p = _pad2d(ubw.astype(f32), Mp, Pp)
    lbw_p = _pad2d(lbw.astype(f32), Mp, Pp)
    w_p = _pad2d(w.astype(f32), Pp, Qp)
    b_p = _pad2d(b.astype(f32).reshape(1, P), 1, Pp)
    ubb_p = _pad2d(ub_bias.astype(f32).reshape(M, 1), Mp, 1)
    lbb_p = _pad2d(lb_bias.astype(f32).reshape(M, 1), Mp, 1)

    grid = (Mp // tm, Qp // tn, Pp // tk)

    # TODO(synk): exploit the structural sparsity of the unrolled conv matrix
    # (skip all-zero K tiles via scalar-prefetched nonzero block indices, or
    # express the product as a convolution over the bounds tensors).

    uw, lw, ubb, lbb = pl.pallas_call(
        _backsub_fused_kernel,
        out_shape=(jax.ShapeDtypeStruct((Mp, Qp), f32),
                   jax.ShapeDtypeStruct((Mp, Qp), f32),
                   jax.ShapeDtypeStruct((Mp, 1), f32),
                   jax.ShapeDtypeStruct((Mp, 1), f32)),
        grid_spec=pltpu.PrefetchScalarGridSpec(
            num_scalar_prefetch=0,
            grid=grid,
            in_specs=[
                pl.BlockSpec((tm, tk), lambda i, j, k: (i, k)),   # UBW
                pl.BlockSpec((tm, tk), lambda i, j, k: (i, k)),   # LBW
                pl.BlockSpec((tk, tn), lambda i, j, k: (k, j)),   # W (shared tile)
                pl.BlockSpec((1, tk), lambda i, j, k: (0, k)),    # b row vector
                pl.BlockSpec((tm, 1), lambda i, j, k: (i, 0)),    # ub_bias in
                pl.BlockSpec((tm, 1), lambda i, j, k: (i, 0)),    # lb_bias in
            ],
            out_specs=[
                pl.BlockSpec((tm, tn), lambda i, j, k: (i, j)),   # UBW @ W
                pl.BlockSpec((tm, tn), lambda i, j, k: (i, j)),   # LBW @ W
                pl.BlockSpec((tm, 1), lambda i, j, k: (i, 0)),    # fused ub bias
                pl.BlockSpec((tm, 1), lambda i, j, k: (i, 0)),    # fused lb bias
            ]),
        compiler_params=pltpu.CompilerParams(
            # j (and k) must stay "arbitrary": the fused bias output block is
            # revisited across both axes.  i remains "parallel" so v7x's two
            # TensorCores shard the M axis.
            dimension_semantics=("parallel", "arbitrary", "arbitrary"),
            vmem_limit_bytes=48 * 1024 * 1024),
    )(ubw_p, lbw_p, w_p, b_p, ubb_p, lbb_p)

    return uw[:M, :Q], lw[:M, :Q], ubb[:M, 0], lbb[:M, 0]


# ---------------------------------------------------------------------------
# Module glue (parameter setup / conv unrolling stays in plain numpy/JAX)
# ---------------------------------------------------------------------------

class BackBounds:
    def __init__(self, upperBoundWeights, lowerBoundWeights,
                 upperBoundBias, lowerBoundBias):
        self.upperBoundWeights = upperBoundWeights
        self.lowerBoundWeights = lowerBoundWeights
        self.upperBoundBias = upperBoundBias
        self.lowerBoundBias = lowerBoundBias


class InputTerminator:
    """Terminates the backsubstitution chain (stands in for the input layer)."""
    # TODO(synk): concretization of the back-bounds against the input box
    # (the real `prev` at the bottom of the network) is outside this module.
    def backsubstitution(self, backBounds):
        return backBounds


def build_unrolled_conv(weight, bias, inC, inH, inW, stride, padding, dilation):
    """Numpy reimplementation of AbstractConvLayer.__init__ matrix unrolling."""
    weight = np.asarray(weight)
    bias = np.asarray(bias)
    outC, _, KH, KW = weight.shape
    sh, sw = stride
    ph, pw = padding
    dh, dw = dilation
    outH = (inH + 2 * ph - dh * (KH - 1) - 1) // sh + 1
    outW = (inW + 2 * pw - dw * (KW - 1) - 1) // sw + 1
    Wmat = np.zeros((outC, outH, outW, inC, inH, inW), dtype=np.float32)
    for oh in range(outH):
        for ow in range(outW):
            for kh in range(KH):
                for kw in range(KW):
                    ih = oh * sh - ph + kh * dh
                    iw = ow * sw - pw + kw * dw
                    if 0 <= ih < inH and 0 <= iw < inW:
                        Wmat[:, oh, ow, :, ih, iw] = weight[:, :, kh, kw]
    Wmat = Wmat.reshape(outC * outH * outW, inC * inH * inW)
    bvec = np.repeat(bias.astype(np.float32), outH * outW)
    return jnp.asarray(Wmat), jnp.asarray(bvec), outH, outW


class AbstractConvLayer:
    def __init__(self, weight, bias, prev, inChannels, inHeight, inWidth,
                 stride=(1, 1), padding=(1, 1), dilation=(1, 1)):
        self.prev = prev
        self.weights, self.bias, self.outHeight, self.outWidth = build_unrolled_conv(
            weight, bias, inChannels, inHeight, inWidth, stride, padding, dilation)
        self.outChannels = int(weight.shape[0])

    def backsubstitution(self, backBounds: BackBounds) -> BackBounds:
        ubw, lbw, ubb, lbb = backsubstitute_affine(
            backBounds.upperBoundWeights,
            backBounds.lowerBoundWeights,
            self.weights,
            self.bias,
            backBounds.upperBoundBias,
            backBounds.lowerBoundBias)
        return self.prev.backsubstitution(BackBounds(ubw, lbw, ubb, lbb))

    def forward(self, bounds=None) -> BackBounds:
        backBounds = BackBounds(upperBoundWeights=self.weights,
                                lowerBoundWeights=self.weights,
                                upperBoundBias=self.bias,
                                lowerBoundBias=self.bias)
        return self.prev.backsubstitution(backBounds)


# ---------------------------------------------------------------------------
# Demo / correctness check
# ---------------------------------------------------------------------------

if __name__ == "__main__":
    key = jax.random.PRNGKey(0)
    k1, k2, k3, k4 = jax.random.split(key, 4)

    # conv1: 2 -> 4 channels on 8x8, k=3, s=1, p=1  (input feature dim 2*8*8 = 128)
    # conv2: 4 -> 4 channels on 8x8, k=3, s=1, p=1  (feature dims 4*8*8 = 256)
    w1 = jax.random.uniform(k1, (4, 2, 3, 3), jnp.float32, -0.5, 0.5)
    b1 = jax.random.uniform(k2, (4,), jnp.float32, -0.5, 0.5)
    w2 = jax.random.uniform(k3, (4, 4, 3, 3), jnp.float32, -0.5, 0.5)
    b2 = jax.random.uniform(k4, (4,), jnp.float32, -0.5, 0.5)

    layer0 = InputTerminator()
    layer1 = AbstractConvLayer(w1, b1, prev=layer0, inChannels=2, inHeight=8, inWidth=8)
    layer2 = AbstractConvLayer(w2, b2, prev=layer1, inChannels=4, inHeight=8, inWidth=8)

    # forward(): seeds BackBounds with layer2's unrolled conv matrix and
    # backsubstitutes it through layer1 (the fused Pallas kernel hot path).
    result = layer2.forward(None)
    jax.block_until_ready(result.upperBoundWeights)
    jax.block_until_ready(result.upperBoundBias)

    # pure-JAX reference
    W2, B2 = layer2.weights, layer2.bias
    W1, B1 = layer1.weights, layer1.bias
    ref_w = W2 @ W1                      # (256, 128)
    ref_b = B2 + W2 @ B1                 # (256,)

    assert result.upperBoundWeights.shape == (256, 128)
    assert result.lowerBoundWeights.shape == (256, 128)
    assert result.upperBoundBias.shape == (256,)
    assert result.lowerBoundBias.shape == (256,)
    np.testing.assert_allclose(np.asarray(result.upperBoundWeights),
                               np.asarray(ref_w), rtol=1e-5, atol=1e-5)
    np.testing.assert_allclose(np.asarray(result.lowerBoundWeights),
                               np.asarray(ref_w), rtol=1e-5, atol=1e-5)
    np.testing.assert_allclose(np.asarray(result.upperBoundBias),
                               np.asarray(ref_b), rtol=1e-5, atol=1e-5)
    np.testing.assert_allclose(np.asarray(result.lowerBoundBias),
                               np.asarray(ref_b), rtol=1e-5, atol=1e-5)

    print("KERNEL_OK")
</pallas_src>

<mosaic_0001>
module attributes {stable_mosaic.version = 11 : i64} {
  func.func @_backsub_fused_kernel(%arg0: i32, %arg1: i32, %arg2: i32, %arg3: memref<256x256xf32, #tpu.memory_space<vmem>>, %arg4: memref<256x256xf32, #tpu.memory_space<vmem>>, %arg5: memref<256x128xf32, #tpu.memory_space<vmem>>, %arg6: memref<1x256xf32, #tpu.memory_space<vmem>>, %arg7: memref<256x1xf32, #tpu.memory_space<vmem>>, %arg8: memref<256x1xf32, #tpu.memory_space<vmem>>, %arg9: memref<256x128xf32, #tpu.memory_space<vmem>>, %arg10: memref<256x128xf32, #tpu.memory_space<vmem>>, %arg11: memref<256x1xf32, #tpu.memory_space<vmem>>, %arg12: memref<256x1xf32, #tpu.memory_space<vmem>>) attributes {dimension_semantics = [#tpu.dimension_semantics<parallel>, #tpu.dimension_semantics<arbitrary>, #tpu.dimension_semantics<arbitrary>], iteration_bounds = array<i64: 1, 1, 1>, scalar_prefetch = 0 : i64, scratch_operands = 0 : i64, tpu.core_type = #tpu.core_type<tc>, window_params = [{transform_indices = @transform_0, window_bounds = array<i64: 256, 256>}, {transform_indices = @transform_1, window_bounds = array<i64: 256, 256>}, {transform_indices = @transform_2, window_bounds = array<i64: 256, 128>}, {transform_indices = @transform_3, window_bounds = array<i64: 1, 256>}, {transform_indices = @transform_4, window_bounds = array<i64: 256, 1>}, {transform_indices = @transform_5, window_bounds = array<i64: 256, 1>}, {transform_indices = @transform_6, window_bounds = array<i64: 256, 128>}, {transform_indices = @transform_7, window_bounds = array<i64: 256, 128>}, {transform_indices = @transform_8, window_bounds = array<i64: 256, 1>}, {transform_indices = @transform_9, window_bounds = array<i64: 256, 1>}]} {
    %c0_i32 = arith.constant 0 : i32
    %0 = arith.cmpi eq, %arg2, %c0_i32 : i32
    %1 = arith.extui %0 : i1 to i32
    %c0_i32_0 = arith.constant 0 : i32
    %2 = arith.cmpi ne, %1, %c0_i32_0 : i32
    scf.if %2 {
      %cst_20 = arith.constant 0.000000e+00 : f32
      %22 = vector.broadcast %cst_20 : f32 to vector<256x128xf32>
      %c0_21 = arith.constant 0 : index
      %c0_22 = arith.constant 0 : index
      %23 = vector.load %arg9[%c0_21, %c0_22] : memref<256x128xf32, #tpu.memory_space<vmem>>, vector<256x128xf32>
      tpu.vector_store %arg9[%c0_21, %c0_22], %22 {strides = array<i32>} : memref<256x128xf32, #tpu.memory_space<vmem>>, vector<256x128xf32>,
      %cst_23 = arith.constant 0.000000e+00 : f32
      %24 = vector.broadcast %cst_23 : f32 to vector<256x128xf32>
      %c0_24 = arith.constant 0 : index
      %c0_25 = arith.constant 0 : index
      %25 = vector.load %arg10[%c0_24, %c0_25] : memref<256x128xf32, #tpu.memory_space<vmem>>, vector<256x128xf32>
      tpu.vector_store %arg10[%c0_24, %c0_25], %24 {strides = array<i32>} : memref<256x128xf32, #tpu.memory_space<vmem>>, vector<256x128xf32>,
    } else {
    }
    %c0 = arith.constant 0 : index
    %c0_1 = arith.constant 0 : index
    %3 = vector.load %arg3[%c0, %c0_1] : memref<256x256xf32, #tpu.memory_space<vmem>>, vector<256x256xf32>
    %c0_2 = arith.constant 0 : index
    %c0_3 = arith.constant 0 : index
    %4 = vector.load %arg4[%c0_2, %c0_3] : memref<256x256xf32, #tpu.memory_space<vmem>>, vector<256x256xf32>
    %c0_4 = arith.constant 0 : index
    %c0_5 = arith.constant 0 : index
    %5 = vector.load %arg5[%c0_4, %c0_5] : memref<256x128xf32, #tpu.memory_space<vmem>>, vector<256x128xf32>
    %c0_6 = arith.constant 0 : index
    %c0_7 = arith.constant 0 : index
    %6 = vector.load %arg9[%c0_6, %c0_7] : memref<256x128xf32, #tpu.memory_space<vmem>>, vector<256x128xf32>
    %cst = arith.constant dense<0.000000e+00> : vector<256x128xf32>
    %7 = tpu.matmul %3, %5, %cst {dimension_numbers = #tpu.dot_dimension_numbers<[1], [0], [0], [1], [0, 0, 1, 1], [], []>} : vector<256x256xf32>, vector<256x128xf32>, vector<256x128xf32> -> vector<256x128xf32>
    %8 = arith.addf %6, %7 : vector<256x128xf32>
    %c0_8 = arith.constant 0 : index
    %c0_9 = arith.constant 0 : index
    %9 = vector.load %arg9[%c0_8, %c0_9] : memref<256x128xf32, #tpu.memory_space<vmem>>, vector<256x128xf32>
    tpu.vector_store %arg9[%c0_8, %c0_9], %8 {strides = array<i32>} : memref<256x128xf32, #tpu.memory_space<vmem>>, vector<256x128xf32>,
    %c0_10 = arith.constant 0 : index
    %c0_11 = arith.constant 0 : index
    %10 = vector.load %arg10[%c0_10, %c0_11] : memref<256x128xf32, #tpu.memory_space<vmem>>, vector<256x128xf32>
    %cst_12 = arith.constant dense<0.000000e+00> : vector<256x128xf32>
    %11 = tpu.matmul %4, %5, %cst_12 {dimension_numbers = #tpu.dot_dimension_numbers<[1], [0], [0], [1], [0, 0, 1, 1], [], []>} : vector<256x256xf32>, vector<256x128xf32>, vector<256x128xf32> -> vector<256x128xf32>
    %12 = arith.addf %10, %11 : vector<256x128xf32>
    %c0_13 = arith.constant 0 : index
    %c0_14 = arith.constant 0 : index
    %13 = vector.load %arg10[%c0_13, %c0_14] : memref<256x128xf32, #tpu.memory_space<vmem>>, vector<256x128xf32>
    tpu.vector_store %arg10[%c0_13, %c0_14], %12 {strides = array<i32>} : memref<256x128xf32, #tpu.memory_space<vmem>>, vector<256x128xf32>,
    %c0_i32_15 = arith.constant 0 : i32
    %14 = arith.cmpi eq, %arg1, %c0_i32_15 : i32
    %c0_i32_16 = arith.constant 0 : i32
    %15 = arith.cmpi eq, %arg2, %c0_i32_16 : i32
    %16 = arith.andi %14, %15 : i1
    %17 = arith.extui %16 : i1 to i32
    %c0_i32_17 = arith.constant 0 : i32
    %18 = arith.cmpi ne, %17, %c0_i32_17 : i32
    scf.if %18 {
      %c0_20 = arith.constant 0 : index
      %c0_21 = arith.constant 0 : index
      %22 = vector.load %arg7[%c0_20, %c0_21] : memref<256x1xf32, #tpu.memory_space<vmem>>, vector<256x1xf32>
      %c0_22 = arith.constant 0 : index
      %c0_23 = arith.constant 0 : index
      %23 = vector.load %arg11[%c0_22, %c0_23] : memref<256x1xf32, #tpu.memory_space<vmem>>, vector<256x1xf32>
      tpu.vector_store %arg11[%c0_22, %c0_23], %22 {strides = array<i32>} : memref<256x1xf32, #tpu.memory_space<vmem>>, vector<256x1xf32>,
      %c0_24 = arith.constant 0 : index
      %c0_25 = arith.constant 0 : index
      %24 = vector.load %arg8[%c0_24, %c0_25] : memref<256x1xf32, #tpu.memory_space<vmem>>, vector<256x1xf32>
      %c0_26 = arith.constant 0 : index
      %c0_27 = arith.constant 0 : index
      %25 = vector.load %arg12[%c0_26, %c0_27] : memref<256x1xf32, #tpu.memory_space<vmem>>, vector<256x1xf32>
      tpu.vector_store %arg12[%c0_26, %c0_27], %24 {strides = array<i32>} : memref<256x1xf32, #tpu.memory_space<vmem>>, vector<256x1xf32>,
    } else {
    }
    %c0_i32_18 = arith.constant 0 : i32
    %19 = arith.cmpi eq, %arg1, %c0_i32_18 : i32
    %20 = arith.extui %19 : i1 to i32
    %c0_i32_19 = arith.constant 0 : i32
    %21 = arith.cmpi ne, %20, %c0_i32_19 : i32
    scf.if %21 {
      %c0_20 = arith.constant 0 : index
      %c0_21 = arith.constant 0 : index
      %22 = vector.load %arg6[%c0_20, %c0_21] : memref<1x256xf32, #tpu.memory_space<vmem>>, vector<1x256xf32>
      %c0_22 = arith.constant 0 : index
      %c0_23 = arith.constant 0 : index
      %23 = vector.load %arg11[%c0_22, %c0_23] : memref<256x1xf32, #tpu.memory_space<vmem>>, vector<256x1xf32>
      %24 = vector.broadcast %22 : vector<1x256xf32> to vector<256x256xf32>
      %25 = arith.mulf %3, %24 : vector<256x256xf32>
      %cst_24 = arith.constant dense<0.000000e+00> : vector<256xf32>
      %26 = vector.multi_reduction <add>, %25, %cst_24 [1] : vector<256x256xf32> to vector<256xf32>
      %27 = vector.shape_cast %26 : vector<256xf32> to vector<256x1xf32>
      %28 = arith.addf %23, %27 : vector<256x1xf32>
      %c0_25 = arith.constant 0 : index
      %c0_26 = arith.constant 0 : index
      %29 = vector.load %arg11[%c0_25, %c0_26] : memref<256x1xf32, #tpu.memory_space<vmem>>, vector<256x1xf32>
      tpu.vector_store %arg11[%c0_25, %c0_26], %28 {strides = array<i32>} : memref<256x1xf32, #tpu.memory_space<vmem>>, vector<256x1xf32>,
      %c0_27 = arith.constant 0 : index
      %c0_28 = arith.constant 0 : index
      %30 = vector.load %arg12[%c0_27, %c0_28] : memref<256x1xf32, #tpu.memory_space<vmem>>, vector<256x1xf32>
      %31 = vector.broadcast %22 : vector<1x256xf32> to vector<256x256xf32>
      %32 = arith.mulf %4, %31 : vector<256x256xf32>
      %cst_29 = arith.constant dense<0.000000e+00> : vector<256xf32>
      %33 = vector.multi_reduction <add>, %32, %cst_29 [1] : vector<256x256xf32> to vector<256xf32>
      %34 = vector.shape_cast %33 : vector<256xf32> to vector<256x1xf32>
      %35 = arith.addf %30, %34 : vector<256x1xf32>
      %c0_30 = arith.constant 0 : index
      %c0_31 = arith.constant 0 : index
      %36 = vector.load %arg12[%c0_30, %c0_31] : memref<256x1xf32, #tpu.memory_space<vmem>>, vector<256x1xf32>
      tpu.vector_store %arg12[%c0_30, %c0_31], %35 {strides = array<i32>} : memref<256x1xf32, #tpu.memory_space<vmem>>, vector<256x1xf32>,
    } else {
    }
    return
  }
  func.func @transform_0(%arg0: i32, %arg1: i32, %arg2: i32) -> (i32, i32) {
    %c0_i32 = arith.constant 0 : i32
    return %arg0, %arg2 : i32, i32
  }
  func.func @transform_1(%arg0: i32, %arg1: i32, %arg2: i32) -> (i32, i32) {
    %c0_i32 = arith.constant 0 : i32
    return %arg0, %arg2 : i32, i32
  }
  func.func @transform_2(%arg0: i32, %arg1: i32, %arg2: i32) -> (i32, i32) {
    %c0_i32 = arith.constant 0 : i32
    return %arg2, %arg1 : i32, i32
  }
  func.func @transform_3(%arg0: i32, %arg1: i32, %arg2: i32) -> (i32, i32) {
    %c0_i32 = arith.constant 0 : i32
    %c0_i32_0 = arith.constant 0 : i32
    return %c0_i32, %arg2 : i32, i32
  }
  func.func @transform_4(%arg0: i32, %arg1: i32, %arg2: i32) -> (i32, i32) {
    %c0_i32 = arith.constant 0 : i32
    %c0_i32_0 = arith.constant 0 : i32
    return %arg0, %c0_i32 : i32, i32
  }
  func.func @transform_5(%arg0: i32, %arg1: i32, %arg2: i32) -> (i32, i32) {
    %c0_i32 = arith.constant 0 : i32
    %c0_i32_0 = arith.constant 0 : i32
    return %arg0, %c0_i32 : i32, i32
  }
  func.func @transform_6(%arg0: i32, %arg1: i32, %arg2: i32) -> (i32, i32) {
    %c0_i32 = arith.constant 0 : i32
    return %arg0, %arg1 : i32, i32
  }
  func.func @transform_7(%arg0: i32, %arg1: i32, %arg2: i32) -> (i32, i32) {
    %c0_i32 = arith.constant 0 : i32
    return %arg0, %arg1 : i32, i32
  }
  func.func @transform_8(%arg0: i32, %arg1: i32, %arg2: i32) -> (i32, i32) {
    %c0_i32 = arith.constant 0 : i32
    %c0_i32_0 = arith.constant 0 : i32
    return %arg0, %c0_i32 : i32, i32
  }
  func.func @transform_9(%arg0: i32, %arg1: i32, %arg2: i32) -> (i32, i32) {
    %c0_i32 = arith.constant 0 : i32
    %c0_i32_0 = arith.constant 0 : i32
    return %arg0, %c0_i32 : i32, i32
  }
}

</mosaic_0001>

<bundles_post_ra>
// kernel: tpu_custom_call.1
= control target key start
LH: loop header
LB: loop body
LE: loop exit
PB: predicated region body
PF: predicated region fallthrough
CT: control target
= control target key end

     0   :  { %15 = vsyncpa [#allocation3], 0  ;;  %s4175_s0 = inlined_call_operand.vmem [shape: f32[256,256], index: 0, kind: input, shape index: {}]   ;;  %s4176_s1 = inlined_call_operand.hbm [shape: f32[256,256], index: 1, kind: input, shape index: {}]   ;;  %s4177_s2 = inlined_call_operand.hbm [shape: f32[256,128], index: 2, kind: input, shape index: {}]   ;;  %s4178_s3 = inlined_call_operand.vmem [shape: f32[1,256], index: 3, kind: input, shape index: {}]   ;;  %s4179_s4 = inlined_call_operand.vmem [shape: f32[256,1], index: 4, kind: input, shape index: {}]   ;;  %s4180_s5 = inlined_call_operand.vmem [shape: f32[256,1], index: 5, kind: input, shape index: {}]   ;;  %s4181_s6 = inlined_call_operand.hbm [shape: f32[256,128], index: 6, kind: output, shape index: {0}]   ;;  %s4182_s7 = inlined_call_operand.hbm [shape: f32[256,128], index: 7, kind: output, shape index: {1}]   ;;  %s4183_s8 = inlined_call_operand.vmem [shape: f32[256,1], index: 8, kind: output, shape index: {2}]   ;;  %s4184_s9 = inlined_call_operand.vmem [shape: f32[256,1], index: 9, kind: output, shape index: {3}]  }
   0x1   :  { %16 = vsyncpa [#allocation6], 0 }
   0x2   :  { %17 = vsyncpa [#allocation4], 0 }
   0x3   :  { %18 = vsyncpa [#allocation9], 0  ;;  %s1833_s30 = smov [#allocation2]   ;;  %s1737_s13 = scalar_lea.hbm %s4176_s1, 8192 }
   0x4   :  { %s26_s10 = sshll.u32 %s1833_s30, 4  ;;  %p1738_p0 = scmp.ne.s32.totalorder %s4176_s1, %s1737_s13  ;;  %s27_s10 = int_to_ptr.vmem [resolvable:$true] %s26_s10 }
   0x5   :  { %p1741_p1 = scmp.lt.u32.totalorder %s1737_s13, %s4176_s1 }
   0x7   :  { %p1743_p2 = pnand %p1741_p1, %p1738_p0 }
   0x9   :  { %1746 = shalt.err (!%p1743_p2)
}
   0xa   :  { %s1747_s18 = scalar_lea.vmem %s27_s10, 8192  ;;  %p1752_p4 = scmp.lt.s32.totalorder %s27_s10, %s27_s10 }
   0xb   :  { %p1748_p3 = scmp.ne.s32.totalorder %s27_s10, %s1747_s18  ;;  %p1753_p5 = scmp.lt.s32.totalorder %s1747_s18, %s1747_s18 }
   0xd   :  { %p1754_p6 = por %p1753_p5, %p1752_p4 }
   0xf   :  { %p1755_p7 = pnand %p1754_p6, %p1748_p3 }
  0x11   :  { %1758 = shalt.err (!%p1755_p7)
}
  0x12   :  { %s1834_s19 = smov 256   ;;  %s1835_s20 = smov 16  }
  0x13   :  { %32 = dma.hbm_to_vmem [thread:$0]  %s4176_s1, 8192, %s27_s10, [#allocation3], %s1834_s19, %s1834_s19, %s1835_s20  }
  0x14   :  { %s1836_s23 = smov [#allocation5]   ;;  %s1759_s27 = scalar_lea.hbm %s4177_s2, 4096 }
  0x15   :  { %s38_s24 = sshll.u32 %s1836_s23, 4  ;;  %p1760_p8 = scmp.ne.s32.totalorder %s4177_s2, %s1759_s27  ;;  %s39_s24 = int_to_ptr.vmem [resolvable:$true] %s38_s24 }
  0x16   :  { %p1763_p9 = scmp.lt.u32.totalorder %s1759_s27, %s4177_s2 }
  0x18   :  { %p1765_p10 = pnand %p1763_p9, %p1760_p8 }
  0x1a   :  { %1768 = shalt.err (!%p1765_p10)
}
  0x1b   :  { %s1769_s12 = scalar_lea.vmem %s39_s24, 4096  ;;  %p1774_p12 = scmp.lt.s32.totalorder %s39_s24, %s39_s24 }
  0x1c   :  { %p1770_p11 = scmp.ne.s32.totalorder %s39_s24, %s1769_s12  ;;  %p1775_p13 = scmp.lt.s32.totalorder %s1769_s12, %s1769_s12 }
  0x1e   :  { %p1776_p0 = por %p1775_p13, %p1774_p12 }
  0x20   :  { %p1777_p1 = pnand %p1776_p0, %p1770_p11 }
  0x22   :  { %1780 = shalt.err (!%p1777_p1)
}
  0x23   :  { %s1837_s1 = smov 128   ;;  %s1838_s10 = smov 8  }
  0x24   :  { %44 = dma.hbm_to_vmem [thread:$0]  %s4177_s2, 4096, %s39_s24, [#allocation6], %s1837_s1, %s1837_s1, %s1838_s10  }
  0x25   :  { %1825 = dma.done.wait [#allocation3], 8192  }
  0x26   :  { %1826 = vsyncadd [#allocation3], 4294959104 }
  0x27   :  { %1827 = dma.done.wait [#allocation6], 4096  }
  0x28   :  { %1828 = vsyncadd [#allocation6], 4294963200  ;;  %v4188_v0 = vmov 0.0|0.0   ;;  %v253_v1 = vld [vmem:[#allocation5] sm:$0xff]  ;;  %v254_v2 = vld [vmem:[#allocation5 + $0x8] sm:$0xff]  ;;  %v1098_v4 = vlaneseq  ;;  %vm964_vm0 = vcmask 7168  }
  0x29   :  { %1631 = vmatprep.subr.bf16.mxu0 %v4188_v0  ;;  %1679 = vmatprep.subr.bf16.mxu1 %v4188_v0  ;;  %v255_v3 = vld [vmem:[#allocation5 + $0x10] sm:$0xff]  ;;  %v1632_v5 = vpack.c.bf16 %v254_v2, %v253_v1  ;;  %v256_v6 = vld [vmem:[#allocation5 + $0x18] sm:$0xff]  ;;  %v257_v8 = vld [vmem:[#allocation5 + $0x20] sm:$0xff]  ;;  %s1841_s17 = smov [#allocation8]  }
  0x2a   :  { %v1635_v7 = vpack.c.bf16 %v256_v6, %v255_v3  ;;  %v258_v9 = vld [vmem:[#allocation5 + $0x28] sm:$0xff]  ;;  %v1099_v10 = vshrl.u32 %v1098_v4, 7  ;;  %v259_v12 = vld [vmem:[#allocation5 + $0x30] sm:$0xff]  ;;  %v260_v13 = vld [vmem:[#allocation5 + $0x38] sm:$0xff] }
  0x2b   :  { %1633 = vmatpush1.bf16.msra.mxu0 %v1632_v5  ;;  %1681 = vmatpush1.bf16.msra.mxu1 %v1632_v5  ;;  %v1638_v11 = vpack.c.bf16 %v258_v9, %v257_v8  ;;  %v126_v15 = vld [vmem:[%s4175_s0 + $0x8] sm:$0xff]  ;;  %v1641_v16 = vpack.c.bf16 %v260_v13, %v259_v12  ;;  %v261_v17 = vld [vmem:[#allocation5 + $0x40] sm:$0xff]  ;;  %v263_v21 = vld [vmem:[#allocation5 + $0x50] sm:$0xff] }
  0x2c   :  { %1634 = vmatprep.subr.bf16.mxu0 %v4188_v0  ;;  %1682 = vmatprep.subr.bf16.mxu1 %v4188_v0  ;;  %v1104_v14 = vsub.s32 1, %v1099_v10  ;;  %v1064_v18 = vld [vmem:[%s4178_s3] sm:$0x3]  ;;  %v190_v19 = vld [vmem:[#allocation2 + $0x8] sm:$0xff]  ;;  %v264_v22 = vld [vmem:[#allocation5 + $0x58] sm:$0xff]  ;;  %v1100_v32 = vsub.s32 0, %v1099_v10 }
  0x2d   :  { %v262_v20 = vld [vmem:[#allocation5 + $0x48] sm:$0xff]  ;;  %v265_v24 = vld [vmem:[#allocation5 + $0x60] sm:$0xff]  ;;  %v267_v26 = vld [vmem:[#allocation5 + $0x70] sm:$0xff]  ;;  %381 = vmatprep.mubr.f32.mxu0 %v126_v15  ;;  %702 = vmatprep.mubr.f32.mxu1 %v190_v19  ;;  %v1647_v44 = vpack.c.bf16 %v264_v22, %v263_v21  ;;  %s1606_s3 = sshll.u32 %s1841_s17, 4  ;;  %s4138_s3 = int_to_ptr.vmem [resolvable:$true] %s1606_s3 }
  0x2e   :  { %v1933_v23 = vrot.slane %v1064_v18, %v1104_v14  ;;  %v266_v25 = vld [vmem:[#allocation5 + $0x68] sm:$0xff]  ;;  %v268_v27 = vld [vmem:[#allocation5 + $0x78] sm:$0xff]  ;;  %v269_v28 = vld [vmem:[#allocation5 + $0x80] sm:$0xff]  ;;  %v1644_v37 = vpack.c.bf16 %v262_v20, %v261_v17  ;;  %v1940_v48 = vrot.slane %v1064_v18, %v1100_v32 }
  0x2f   :  { %1636 = vmatpush1.bf16.msra.mxu0 %v1635_v7  ;;  %1684 = vmatpush1.bf16.msra.mxu1 %v1635_v7  ;;  %v270_v29 = vld [vmem:[#allocation5 + $0x88] sm:$0xff]  ;;  %v271_v30 = vld [vmem:[#allocation5 + $0x90] sm:$0xff]  ;;  %v272_v31 = vld [vmem:[#allocation5 + $0x98] sm:$0xff]  ;;  %v1942_v49 = vpack.c.bf16 %v266_v25, %v265_v24  ;;  %v1944_v50 = vpack.c.bf16 %v268_v27, %v267_v26 }
  0x30   :  { %1637 = vmatprep.subr.bf16.mxu0 %v4188_v0  ;;  %1685 = vmatprep.subr.bf16.mxu1 %v4188_v0  ;;  %v273_v33 = vld [vmem:[#allocation5 + $0xa0] sm:$0xff]  ;;  %v274_v34 = vld [vmem:[#allocation5 + $0xa8] sm:$0xff]  ;;  %v275_v35 = vld [vmem:[#allocation5 + $0xb0] sm:$0xff]  ;;  %v1936_v36 = vmul.f32 %v1933_v23, %v190_v19  ;;  %v1946_v51 = vpack.c.bf16 %v270_v29, %v269_v28  ;;  %v1948_v52 = vpack.c.bf16 %v272_v31, %v271_v30 }
  0x31   :  { %v276_v38 = vld [vmem:[#allocation5 + $0xb8] sm:$0xff]  ;;  %v277_v39 = vld [vmem:[#allocation5 + $0xc0] sm:$0xff]  ;;  %v278_v40 = vld [vmem:[#allocation5 + $0xc8] sm:$0xff]  ;;  %v1950_v53 = vpack.c.bf16 %v274_v34, %v273_v33  ;;  %v1979_v63 = vmul.f32 %v1933_v23, %v126_v15 }
  0x32   :  { %v279_v41 = vld [vmem:[#allocation5 + $0xd0] sm:$0xff]  ;;  %v280_v42 = vld [vmem:[#allocation5 + $0xd8] sm:$0xff]  ;;  %v281_v43 = vld [vmem:[#allocation5 + $0xe0] sm:$0xff]  ;;  %v1952_v54 = vpack.c.bf16 %v276_v38, %v275_v35  ;;  %v1954_v55 = vpack.c.bf16 %v278_v40, %v277_v39 }
  0x33   :  { %1639 = vmatpush1.bf16.msra.mxu0 %v1638_v11  ;;  %1687 = vmatpush1.bf16.msra.mxu1 %v1638_v11  ;;  %v282_v45 = vld [vmem:[#allocation5 + $0xe8] sm:$0xff]  ;;  %v283_v46 = vld [vmem:[#allocation5 + $0xf0] sm:$0xff]  ;;  %v284_v47 = vld [vmem:[#allocation5 + $0xf8] sm:$0xff]  ;;  %v1960_v57 = vpack.c.bf16 %v280_v42, %v279_v41 }
  0x34   :  { %1640 = vmatprep.subr.bf16.mxu0 %v4188_v0  ;;  %1688 = vmatprep.subr.bf16.mxu1 %v4188_v0  ;;  %v1956_v56 = vld [vmem:[#allocation2] sm:$0xff]  ;;  %v1962_v58 = vpack.c.bf16 %v282_v45, %v281_v43  ;;  %v1964_v59 = vpack.c.bf16 %v284_v47, %v283_v46  ;;  %v1969_v60 = vld [vmem:[%s4175_s0 + $0x18] sm:$0xff]  ;;  %v1992_v3 = vld [vmem:[%s4175_s0 + $0x10] sm:$0xff] }
  0x35   :  { %4303 = vst [vmem:[#allocation14_spill] sm:$0xff] %v1969_v60  ;;  %v1971_v61 = vld [vmem:[#allocation2 + $0x18] sm:$0xff]  ;;  %v1976_v62 = vld [vmem:[%s4175_s0 + $0x20] sm:$0xff]  ;;  %v1983_v1 = vmul.f32 %v1940_v48, %v1956_v56  ;;  %v1987_v2 = vmul.f32 %v1933_v23, %v1969_v60  ;;  %4306 = vst [vmem:[#allocation17_spill] sm:$0xff] %v1992_v3  ;;  %v2009_v8 = vmul.f32 %v1940_v48, %v1992_v3 }
  0x36   :  { %4304 = vst [vmem:[#allocation15_spill] sm:$0xff] %v1971_v61  ;;  %4305 = vst [vmem:[#allocation16_spill] sm:$0xff] %v1976_v62  ;;  %v1994_v4 = vld [vmem:[#allocation2 + $0x10] sm:$0xff]  ;;  %v1999_v5 = vld [vmem:[%s4175_s0 + $0x28] sm:$0xff]  ;;  %v1112_v6 = vmul.f32 %v1940_v48, %v1976_v62  ;;  %v2005_v7 = vmul.f32 %v1933_v23, %v1971_v61 }
  0x37   :  { %1642 = vmatpush1.bf16.msra.mxu0 %v1641_v16  ;;  %1690 = vmatpush1.bf16.msra.mxu1 %v1641_v16  ;;  %4307 = vst [vmem:[#allocation18_spill] sm:$0xff] %v1994_v4  ;;  %4308 = vst [vmem:[#allocation19_spill] sm:$0xff] %v1999_v5  ;;  %v2013_v9 = vmul.f32 %v1940_v48, %v1994_v4  ;;  %v2015_v10 = vld [vmem:[#allocation2 + $0x28] sm:$0xff]  ;;  %v2017_v11 = vld [vmem:[#allocation2 + $0x20] sm:$0xff]  ;;  %v1113_v13 = vmul.f32 %v1933_v23, %v1999_v5 }
  0x38   :  { %1643 = vmatprep.subr.bf16.mxu0 %v4188_v0  ;;  %1691 = vmatprep.subr.bf16.mxu1 %v4188_v0  ;;  %4309 = vst [vmem:[#allocation20_spill] sm:$0xff] %v2015_v10  ;;  %4310 = vst [vmem:[#allocation21_spill] sm:$0xff] %v2017_v11  ;;  %v2022_v12 = vld [vmem:[%s4175_s0 + $0x38] sm:$0xff]  ;;  %v2029_v14 = vld [vmem:[%s4175_s0] sm:$0xff]  ;;  %v2033_v15 = vmul.f32 %v1933_v23, %v2015_v10  ;;  %v2037_v16 = vmul.f32 %v1940_v48, %v2017_v11 }
  0x39   :  { %4311 = vst [vmem:[#allocation22_spill] sm:$0xff] %v2022_v12  ;;  %v1115_v17 = vmul.f32 %v1933_v23, %v2022_v12  ;;  %v2041_v18 = vld [vmem:[#allocation2 + $0x38] sm:$0xff]  ;;  %v2046_v19 = vld [vmem:[%s4175_s0 + $0x30] sm:$0xff]  ;;  %v2065_v25 = vld [vmem:[%s4175_s0 + $0x48] sm:$0xff]  ;;  %v1178_v34 = vadd.f32 %v1113_v13, %v1112_v6  ;;  %v1108_v42 = vmul.f32 %v1940_v48, %v2029_v14 }
  0x3a   :  { %4312 = vst [vmem:[#allocation23_spill] sm:$0xff] %v2041_v18  ;;  %4313 = vst [vmem:[#allocation24_spill] sm:$0xff] %v2046_v19  ;;  %v2048_v20 = vld [vmem:[#allocation2 + $0x30] sm:$0xff]  ;;  %v2054_v21 = vmul.f32 %v1933_v23, %v2041_v18  ;;  %v1114_v22 = vmul.f32 %v1940_v48, %v2046_v19  ;;  %v2067_v26 = vld [vmem:[#allocation2 + $0x48] sm:$0xff]  ;;  %v2076_v28 = vmul.f32 %v1933_v23, %v2065_v25 }
  0x3b   :  { %1645 = vmatpush1.bf16.msra.mxu0 %v1644_v37  ;;  %1693 = vmatpush1.bf16.msra.mxu1 %v1644_v37  ;;  %4314 = vst [vmem:[#allocation25_spill] sm:$0xff] %v2048_v20  ;;  %v2060_v24 = vmul.f32 %v1940_v48, %v2048_v20  ;;  %4315 = vst [vmem:[#allocation26_spill] sm:$0xff] %v2065_v25  ;;  %v2072_v27 = vld [vmem:[%s4175_s0 + $0x40] sm:$0xff]  ;;  %v2080_v29 = vmul.f32 %v1933_v23, %v2067_v26  ;;  %v2091_v32 = vld [vmem:[%s4175_s0 + $0x58] sm:$0xff] }
  0x3c   :  { %1646 = vmatprep.subr.bf16.mxu0 %v4188_v0  ;;  %1694 = vmatprep.subr.bf16.mxu1 %v4188_v0  ;;  %4316 = vst [vmem:[#allocation27_spill] sm:$0xff] %v2067_v26  ;;  %4317 = vst [vmem:[#allocation28_spill] sm:$0xff] %v2072_v27  ;;  %v2084_v30 = vmul.f32 %v1940_v48, %v2072_v27  ;;  %v2086_v31 = vld [vmem:[#allocation2 + $0x40] sm:$0xff]  ;;  %v2093_v33 = vld [vmem:[#allocation2 + $0x58] sm:$0xff]  ;;  %v2101_v37 = vmul.f32 %v1933_v23, %v2091_v32 }
  0x3d   :  { %4318 = vst [vmem:[#allocation29_spill] sm:$0xff] %v2086_v31  ;;  %4319 = vst [vmem:[#allocation30_spill] sm:$0xff] %v2091_v32  ;;  %v2097_v35 = vmul.f32 %v1940_v48, %v2086_v31  ;;  %v2105_v38 = vmul.f32 %v1933_v23, %v2093_v33  ;;  %v2110_v39 = vld [vmem:[%s4175_s0 + $0x50] sm:$0xff]  ;;  %v2117_v41 = vld [vmem:[%s4175_s0 + $0x68] sm:$0xff]  ;;  %1179 = vadd.xlane.f32.xlu1 %v1178_v34 }
  0x3e   :  { %4320 = vst [vmem:[#allocation31_spill] sm:$0xff] %v2093_v33  ;;  %4321 = vst [vmem:[#allocation32_spill] sm:$0xff] %v2110_v39  ;;  %v2112_v40 = vld [vmem:[#allocation2 + $0x50] sm:$0xff]  ;;  %v2125_v43 = vmul.f32 %v1940_v48, %v2110_v39  ;;  %v2133_v45 = vmul.f32 %v1933_v23, %v2117_v41  ;;  %v2135_v46 = vld [vmem:[#allocation2 + $0x68] sm:$0xff] }
  0x3f   :  { %1648 = vmatpush1.bf16.msra.mxu0 %v1647_v44  ;;  %1696 = vmatpush1.bf16.msra.mxu1 %v1647_v44  ;;  %4322 = vst [vmem:[#allocation33_spill] sm:$0xff] %v2112_v40  ;;  %4323 = vst [vmem:[#allocation34_spill] sm:$0xff] %v2117_v41  ;;  %v2129_v44 = vmul.f32 %v1940_v48, %v2112_v40  ;;  %v2140_v47 = vld [vmem:[%s4175_s0 + $0x60] sm:$0xff]  ;;  %v2148_v6 = vmul.f32 %v1933_v23, %v2135_v46  ;;  %v2161_v40 = vld [vmem:[%s4175_s0 + $0x78] sm:$0xff] }
  0x40   :  { %1649 = vmatprep.subr.bf16.mxu0 %v4188_v0  ;;  %1697 = vmatprep.subr.bf16.mxu1 %v4188_v0  ;;  %4324 = vst [vmem:[#allocation35_spill] sm:$0xff] %v2135_v46  ;;  %4325 = vst [vmem:[#allocation36_spill] sm:$0xff] %v2140_v47  ;;  %v2152_v13 = vmul.f32 %v1940_v48, %v2140_v47  ;;  %v2163_v39 = vld [vmem:[#allocation2 + $0x78] sm:$0xff]  ;;  %v2172_v47 = vmul.f32 %v1933_v23, %v2161_v40  ;;  %v2182_v33 = vld [vmem:[#allocation2 + $0x70] sm:$0xff] }
  0x41   :  { %4327 = vst [vmem:[#allocation38_spill] sm:$0xff] %v2161_v40  ;;  %4328 = vst [vmem:[#allocation39_spill] sm:$0xff] %v2163_v39  ;;  %v2187_v32 = vld [vmem:[%s4175_s0 + $0x88] sm:$0xff]  ;;  %v1172_v40 = vadd.f32 %v1979_v63, %v1108_v42  ;;  %v2207_v26 = vld [vmem:[%s4175_s0 + $0x80] sm:$0xff]  ;;  %v1181_v42 = vadd.f32 %v1115_v17, %v1114_v22  ;;  %v4339_v22 = vmov 0.0|0.0  }
  0x42   :  { %4330 = vst [vmem:[#allocation41_spill] sm:$0xff] %v2182_v33  ;;  %4331 = vst [vmem:[#allocation42_spill] sm:$0xff] %v2187_v32  ;;  %v2189_v31 = vld [vmem:[#allocation2 + $0x88] sm:$0xff]  ;;  %v2209_v34 = vld [vmem:[#allocation2 + $0x80] sm:$0xff] }
  0x43   :  { %1651 = vmatpush1.bf16.msra.mxu0 %v1942_v49  ;;  %1699 = vmatpush1.bf16.msra.mxu1 %v1942_v49  ;;  %v2142_v49 = vld [vmem:[#allocation2 + $0x60] sm:$0xff]  ;;  %4332 = vst [vmem:[#allocation43_spill] sm:$0xff] %v2189_v31  ;;  %v2202_v27 = vmul.f32 %v1933_v23, %v2189_v31  ;;  %4333 = vst [vmem:[#allocation44_spill] sm:$0xff] %v2207_v26  ;;  %v2214_v63 = vld [vmem:[%s4175_s0 + $0x98] sm:$0xff]  ;;  %v2220_v31 = vmul.f32 %v1940_v48, %v2207_v26 }
  0x44   :  { %4326 = vst [vmem:[#allocation37_spill] sm:$0xff] %v2142_v49  ;;  %1652 = vmatprep.subr.bf16.mxu0 %v4188_v0  ;;  %1700 = vmatprep.subr.bf16.mxu1 %v4188_v0  ;;  %v2156_v41 = vmul.f32 %v1940_v48, %v2142_v49  ;;  %v2168_v0 = vld [vmem:[%s4175_s0 + $0x70] sm:$0xff]  ;;  %v2176_v49 = vmul.f32 %v1933_v23, %v2163_v39  ;;  %4334 = vst [vmem:[#allocation45_spill] sm:$0xff] %v2209_v34  ;;  %v2230_v25 = vld [vmem:[#allocation2 + $0x98] sm:$0xff] }
  0x45   :  { %4329 = vst [vmem:[#allocation40_spill] sm:$0xff] %v2168_v0  ;;  %v2180_v46 = vmul.f32 %v1940_v48, %v2168_v0  ;;  %v2194_v39 = vmul.f32 %v1940_v48, %v2182_v33  ;;  %v2198_v0 = vmul.f32 %v1933_v23, %v2187_v32  ;;  %4335 = vst [vmem:[#allocation46_spill] sm:$0xff] %v2214_v63  ;;  %v2235_v17 = vld [vmem:[%s4175_s0 + $0x90] sm:$0xff]  ;;  %v2256_v20 = vld [vmem:[%s4175_s0 + $0xa8] sm:$0xff]  ;;  %1173 = vadd.xlane.f32.xlu0 %v1172_v40 }
  0x46   :  { %v2224_v32 = vmul.f32 %v1940_v48, %v2209_v34  ;;  %v2228_v33 = vmul.f32 %v1933_v23, %v2214_v63  ;;  %4336 = vst [vmem:[#allocation47_spill] sm:$0xff] %v2230_v25  ;;  %4337 = vst [vmem:[#allocation48_spill] sm:$0xff] %v2235_v17  ;;  %v2243_v34 = vmul.f32 %v1933_v23, %v2230_v25  ;;  %v2258_v19 = vld [vmem:[#allocation2 + $0xa8] sm:$0xff]  ;;  %v2263_v25 = vld [vmem:[%s4175_s0 + $0xa0] sm:$0xff]  ;;  %1182 = vadd.xlane.f32.xlu1 %v1181_v42 }
  0x47   :  { %1654 = vmatpush1.bf16.msra.mxu0 %v1944_v50  ;;  %1702 = vmatpush1.bf16.msra.mxu1 %v1944_v50  ;;  %v2237_v50 = vld [vmem:[#allocation2 + $0x90] sm:$0xff]  ;;  %v2247_v63 = vmul.f32 %v1940_v48, %v2235_v17  ;;  %4340 = vst [vmem:[#allocation50_spill] sm:$0xff] %v2256_v20  ;;  %4341 = vst [vmem:[#allocation51_spill] sm:$0xff] %v2258_v19  ;;  %v2267_v17 = vmul.f32 %v1933_v23, %v2256_v20  ;;  %v2277_v12 = vld [vmem:[#allocation2 + $0xa0] sm:$0xff] }
  0x48   :  { %4338 = vst [vmem:[#allocation49_spill] sm:$0xff] %v2237_v50  ;;  %1655 = vmatprep.subr.bf16.mxu0 %v4339_v22  ;;  %1703 = vmatprep.subr.bf16.mxu1 %v4339_v22  ;;  %v2251_v26 = vmul.f32 %v1940_v48, %v2237_v50  ;;  %4342 = vst [vmem:[#allocation52_spill] sm:$0xff] %v2263_v25  ;;  %v2271_v50 = vmul.f32 %v1933_v23, %v2258_v19  ;;  %v2282_v11 = vld [vmem:[%s4175_s0 + $0xb8] sm:$0xff]  ;;  %v2301_v10 = vld [vmem:[%s4175_s0 + $0xb0] sm:$0xff] }
  0x49   :  { %v2275_v18 = vmul.f32 %v1940_v48, %v2263_v25  ;;  %4344 = vst [vmem:[#allocation54_spill] sm:$0xff] %v2277_v12  ;;  %4345 = vst [vmem:[#allocation55_spill] sm:$0xff] %v2282_v11  ;;  %v2284_v62 = vld [vmem:[#allocation2 + $0xb8] sm:$0xff]  ;;  %v2288_v20 = vmul.f32 %v1940_v48, %v2277_v12  ;;  %v2292_v19 = vmul.f32 %v1933_v23, %v2282_v11  ;;  %v2303_v5 = vld [vmem:[#allocation2 + $0xb0] sm:$0xff] }
  0x4a   :  { %4343 = vst [vmem:[#allocation53_spill] sm:$0xff] %v2271_v50  ;;  %4346 = vst [vmem:[#allocation56_spill] sm:$0xff] %v2284_v62  ;;  %v2296_v25 = vmul.f32 %v1933_v23, %v2284_v62  ;;  %v2308_v40 = vld [vmem:[%s4175_s0 + $0xc8] sm:$0xff]  ;;  %v1175_v42 = vadd.f32 %v1987_v2, %v2009_v8  ;;  %v2316_v62 = vmul.f32 %v1940_v48, %v2301_v10  ;;  %v2331_v2 = vld [vmem:[%s4175_s0 + $0xc0] sm:$0xff] }
  0x4b   :  { %4347 = vst [vmem:[#allocation57_spill] sm:$0xff] %v2288_v20  ;;  %4349 = vst [vmem:[#allocation59_spill] sm:$0xff] %v2301_v10  ;;  %1657 = vmatpush1.bf16.msra.mxu0 %v1946_v51  ;;  %1705 = vmatpush1.bf16.msra.mxu1 %v1946_v51  ;;  %v2320_v11 = vmul.f32 %v1940_v48, %v2303_v5  ;;  %v2324_v12 = vmul.f32 %v1933_v23, %v2308_v40  ;;  %v2326_v4 = vld [vmem:[#allocation2 + $0xc8] sm:$0xff]  ;;  %v2333_v51 = vld [vmem:[#allocation2 + $0xc0] sm:$0xff] }
  0x4c   :  { %4348 = vst [vmem:[#allocation58_spill] sm:$0xff] %v2296_v25  ;;  %4350 = vst [vmem:[#allocation60_spill] sm:$0xff] %v2303_v5  ;;  %1658 = vmatprep.subr.bf16.mxu0 %v4339_v22  ;;  %1706 = vmatprep.subr.bf16.mxu1 %v4339_v22  ;;  %v2339_v8 = vmul.f32 %v1933_v23, %v2326_v4  ;;  %v2347_v5 = vmul.f32 %v1940_v48, %v2333_v51  ;;  %v2352_v10 = vld [vmem:[%s4175_s0 + $0xd8] sm:$0xff]  ;;  %v2378_v50 = vld [vmem:[%s4175_s0 + $0xe8] sm:$0xff] }
  0x4d   :  { %4351 = vst [vmem:[#allocation61_spill] sm:$0xff] %v2308_v40  ;;  %4352 = vst [vmem:[#allocation62_spill] sm:$0xff] %v2326_v4  ;;  %v2343_v40 = vmul.f32 %v1940_v48, %v2331_v2  ;;  %v2354_v3 = vld [vmem:[#allocation2 + $0xd8] sm:$0xff]  ;;  %v2359_v4 = vld [vmem:[%s4175_s0 + $0xd0] sm:$0xff]  ;;  %1176 = vadd.xlane.f32.xlu0 %v1175_v42 }
  0x4e   :  { %4353 = vst [vmem:[#allocation63_spill] sm:$0xff] %v2331_v2  ;;  %4354 = vst [vmem:[#allocation64_spill] sm:$0xff] %v2333_v51  ;;  %v2363_v2 = vmul.f32 %v1933_v23, %v2352_v10  ;;  %v2367_v51 = vmul.f32 %v1933_v23, %v2354_v3  ;;  %v2380_v20 = vld [vmem:[#allocation2 + $0xe8] sm:$0xff]  ;;  %v2399_v61 = vld [vmem:[%s4175_s0 + $0xe0] sm:$0xff] }
  0x4f   :  { %4355 = vst [vmem:[#allocation65_spill] sm:$0xff] %v2339_v8  ;;  %4356 = vst [vmem:[#allocation66_spill] sm:$0xff] %v2347_v5  ;;  %v2371_v8 = vmul.f32 %v1940_v48, %v2359_v4  ;;  %v2373_v5 = vld [vmem:[#allocation2 + $0xd0] sm:$0xff]  ;;  %v2401_v42 = vld [vmem:[#allocation2 + $0xe0] sm:$0xff]  ;;  %1660 = vmatpush1.bf16.msra.mxu0 %v1948_v52  ;;  %1708 = vmatpush1.bf16.msra.mxu1 %v1948_v52 }
  0x50   :  { %4357 = vst [vmem:[#allocation67_spill] sm:$0xff] %v2352_v10  ;;  %4358 = vst [vmem:[#allocation68_spill] sm:$0xff] %v2354_v3  ;;  %v1187_v10 = vadd.f32 %v2101_v37, %v2125_v43  ;;  %v2386_v3 = vmul.f32 %v1940_v48, %v2373_v5  ;;  %v2406_v37 = vld [vmem:[%s4175_s0 + $0xf8] sm:$0xff]  ;;  %v1184_v43 = vadd.f32 %v2076_v28, %v2084_v30  ;;  %v2429_v28 = vld [vmem:[%s4175_s0 + $0xf0] sm:$0xff]  ;;  %1661 = vmatprep.subr.bf16.mxu0 %v4339_v22 }
  0x51   :  { %4359 = vst [vmem:[#allocation69_spill] sm:$0xff] %v2359_v4  ;;  %4360 = vst [vmem:[#allocation70_spill] sm:$0xff] %v2367_v51  ;;  %v2390_v4 = vmul.f32 %v1933_v23, %v2378_v50  ;;  %v2394_v51 = vmul.f32 %v1933_v23, %v2380_v20  ;;  %v2431_v52 = vld [vmem:[#allocation2 + $0xf0] sm:$0xff]  ;;  %1709 = vmatprep.subr.bf16.mxu1 %v4339_v22 }
  0x52   :  { %4361 = vst [vmem:[#allocation71_spill] sm:$0xff] %v2373_v5  ;;  %4362 = vst [vmem:[#allocation72_spill] sm:$0xff] %v2378_v50  ;;  %v2418_v50 = vmul.f32 %v1940_v48, %v2401_v42  ;;  %v2422_v5 = vmul.f32 %v1933_v23, %v2406_v37  ;;  %1188 = vadd.xlane.f32.xlu1 %v1187_v10  ;;  %1185 = vadd.xlane.f32.xlu0 %v1184_v43 }
  0x53   :  { %4363 = vst [vmem:[#allocation73_spill] sm:$0xff] %v2380_v20  ;;  %4364 = vst [vmem:[#allocation74_spill] sm:$0xff] %v2386_v3  ;;  %v2414_v20 = vmul.f32 %v1940_v48, %v2399_v61  ;;  %1663 = vmatpush1.bf16.msra.mxu0 %v1950_v53  ;;  %1711 = vmatpush1.bf16.msra.mxu1 %v1950_v53  ;;  %v2523_v53 = vld [vmem:[%s4175_s0 + $0x120] sm:$0xff] }
  0x54   :  { %4365 = vst [vmem:[#allocation75_spill] sm:$0xff] %v2394_v51  ;;  %4366 = vst [vmem:[#allocation76_spill] sm:$0xff] %v2399_v61  ;;  %v2424_v51 = vld [vmem:[#allocation2 + $0xf8] sm:$0xff]  ;;  %v2450_v61 = vld [vmem:[%s4175_s0 + $0x108] sm:$0xff]  ;;  %1664 = vmatprep.subr.bf16.mxu0 %v4339_v22  ;;  %1712 = vmatprep.subr.bf16.mxu1 %v4339_v22 }
  0x55   :  { %4367 = vst [vmem:[#allocation77_spill] sm:$0xff] %v2401_v42  ;;  %4368 = vst [vmem:[#allocation78_spill] sm:$0xff] %v2406_v37  ;;  %v2437_v30 = vmul.f32 %v1933_v23, %v2424_v51  ;;  %v2441_v37 = vmul.f32 %v1940_v48, %v2429_v28  ;;  %v2445_v42 = vmul.f32 %v1940_v48, %v2431_v52 }
  0x56   :  { %4369 = vst [vmem:[#allocation79_spill] sm:$0xff] %v2418_v50  ;;  %4370 = vst [vmem:[#allocation80_spill] sm:$0xff] %v2424_v51  ;;  %v2452_v50 = vld [vmem:[#allocation2 + $0x108] sm:$0xff]  ;;  %v2456_v3 = vmul.f32 %v1933_v23, %v2450_v61  ;;  %v2463_v51 = vld [vmem:[#allocation2 + $0x100] sm:$0xff] }
  0x57   :  { %4371 = vst [vmem:[#allocation81_spill] sm:$0xff] %v2429_v28  ;;  %4372 = vst [vmem:[#allocation82_spill] sm:$0xff] %v2431_v52  ;;  %v2461_v28 = vld [vmem:[%s4175_s0 + $0x100] sm:$0xff]  ;;  %v2468_v52 = vld [vmem:[%s4175_s0 + $0x118] sm:$0xff]  ;;  %v2484_v25 = vmul.f32 %v1940_v48, %v2463_v51  ;;  %1666 = vmatpush1.bf16.msra.mxu0 %v1952_v54  ;;  %1714 = vmatpush1.bf16.msra.mxu1 %v1952_v54 }
  0x58   :  { %4373 = vst [vmem:[#allocation83_spill] sm:$0xff] %v2437_v30  ;;  %4374 = vst [vmem:[#allocation84_spill] sm:$0xff] %v2445_v42  ;;  %v1193_v30 = vadd.f32 %v2172_v47, %v2180_v46  ;;  %v2476_v42 = vmul.f32 %v1933_v23, %v2452_v50  ;;  %v2480_v60 = vmul.f32 %v1940_v48, %v2461_v28  ;;  %v2490_v46 = vld [vmem:[#allocation2 + $0x118] sm:$0xff]  ;;  %v2497_v47 = vld [vmem:[#allocation2 + $0x110] sm:$0xff]  ;;  %1667 = vmatprep.subr.bf16.mxu0 %v4339_v22 }
  0x59   :  { %4375 = vst [vmem:[#allocation85_spill] sm:$0xff] %v2450_v61  ;;  %4376 = vst [vmem:[#allocation86_spill] sm:$0xff] %v2452_v50  ;;  %v1190_v61 = vadd.f32 %v2133_v45, %v2152_v13  ;;  %v2488_v10 = vmul.f32 %v1933_v23, %v2468_v52  ;;  %v2495_v45 = vld [vmem:[%s4175_s0 + $0x110] sm:$0xff]  ;;  %v2503_v13 = vmul.f32 %v1933_v23, %v2490_v46  ;;  %v2539_v50 = vld [vmem:[#allocation2 + $0x120] sm:$0xff]  ;;  %1715 = vmatprep.subr.bf16.mxu1 %v4339_v22 }
  0x5a   :  { %4377 = vst [vmem:[#allocation87_spill] sm:$0xff] %v2461_v28  ;;  %4378 = vst [vmem:[#allocation88_spill] sm:$0xff] %v2463_v51  ;;  %v2507_v43 = vmul.f32 %v1940_v48, %v2495_v45  ;;  %v2513_v51 = vld [vmem:[#allocation2 + $0x128] sm:$0xff]  ;;  %1194 = vadd.xlane.f32.xlu1 %v1193_v30  ;;  %v2612_v54 = vld [vmem:[%s4175_s0 + $0x158] sm:$0xff] }
  0x5b   :  { %4379 = vst [vmem:[#allocation89_spill] sm:$0xff] %v2468_v52  ;;  %4380 = vst [vmem:[#allocation90_spill] sm:$0xff] %v2476_v42  ;;  %v2511_v52 = vmul.f32 %v1940_v48, %v2497_v47  ;;  %v2518_v28 = vld [vmem:[%s4175_s0 + $0x128] sm:$0xff]  ;;  %v2541_v42 = vld [vmem:[#allocation2 + $0x138] sm:$0xff]  ;;  %1191 = vadd.xlane.f32.xlu0 %v1190_v61  ;;  %1669 = vmatpush1.bf16.msra.mxu0 %v1954_v55 }
  0x5c   :  { %4381 = vst [vmem:[#allocation91_spill] sm:$0xff] %v2484_v25  ;;  %4382 = vst [vmem:[#allocation92_spill] sm:$0xff] %v2490_v46  ;;  %v2537_v46 = vmul.f32 %v1940_v48, %v2523_v53  ;;  %v2545_v25 = vmul.f32 %v1940_v48, %v2539_v50  ;;  %1717 = vmatpush1.bf16.msra.mxu1 %v1954_v55  ;;  %v2701_v55 = vld [vmem:[#allocation2 + $0x188] sm:$0xff]  ;;  %1670 = vmatprep.subr.bf16.mxu0 %v4339_v22 }
  0x5d   :  { %4383 = vst [vmem:[#allocation93_spill] sm:$0xff] %v2495_v45  ;;  %4384 = vst [vmem:[#allocation94_spill] sm:$0xff] %v2497_v47  ;;  %v2529_v47 = vmul.f32 %v1933_v23, %v2513_v51  ;;  %v2533_v45 = vmul.f32 %v1933_v23, %v2518_v28  ;;  %1718 = vmatprep.subr.bf16.mxu1 %v4339_v22 }
  0x5e   :  { %4385 = vst [vmem:[#allocation95_spill] sm:$0xff] %v2503_v13  ;;  %4386 = vst [vmem:[#allocation96_spill] sm:$0xff] %v2511_v52 }
  0x5f   :  { %4387 = vst [vmem:[#allocation97_spill] sm:$0xff] %v2513_v51  ;;  %4388 = vst [vmem:[#allocation98_spill] sm:$0xff] %v2518_v28  ;;  %v2550_v51 = vld [vmem:[%s4175_s0 + $0x138] sm:$0xff]  ;;  %v2555_v28 = vld [vmem:[%s4175_s0 + $0x130] sm:$0xff]  ;;  %1672 = vmatpush1.bf16.msra.mxu0 %v1960_v57 }
  0x60   :  { %4389 = vst [vmem:[#allocation99_spill] sm:$0xff] %v2523_v53  ;;  %4390 = vst [vmem:[#allocation100_spill] sm:$0xff] %v2529_v47  ;;  %v2557_v53 = vld [vmem:[#allocation2 + $0x130] sm:$0xff]  ;;  %v1199_v47 = vadd.f32 %v2228_v33, %v2247_v63  ;;  %v2569_v13 = vmul.f32 %v1933_v23, %v2550_v51  ;;  %v2573_v52 = vmul.f32 %v1940_v48, %v2555_v28  ;;  %v2579_v33 = vld [vmem:[#allocation2 + $0x148] sm:$0xff]  ;;  %1720 = vmatpush1.bf16.msra.mxu1 %v1960_v57 }
  0x61   :  { %4391 = vst [vmem:[#allocation101_spill] sm:$0xff] %v2539_v50  ;;  %4392 = vst [vmem:[#allocation102_spill] sm:$0xff] %v2541_v42  ;;  %v1196_v50 = vadd.f32 %v2198_v0, %v2220_v31  ;;  %v2577_v61 = vmul.f32 %v1940_v48, %v2557_v53  ;;  %v2584_v0 = vld [vmem:[%s4175_s0 + $0x148] sm:$0xff]  ;;  %v2589_v31 = vld [vmem:[%s4175_s0 + $0x140] sm:$0xff]  ;;  %v2595_v63 = vmul.f32 %v1933_v23, %v2579_v33  ;;  %1673 = vmatprep.subr.bf16.mxu0 %v4339_v22 }
  0x62   :  { %4393 = vst [vmem:[#allocation103_spill] sm:$0xff] %v2545_v25  ;;  %4394 = vst [vmem:[#allocation104_spill] sm:$0xff] %v2550_v51  ;;  %v2565_v25 = vmul.f32 %v1933_v23, %v2541_v42  ;;  %v2599_v30 = vmul.f32 %v1933_v23, %v2584_v0  ;;  %v2607_v51 = vld [vmem:[#allocation2 + $0x158] sm:$0xff]  ;;  %v2631_v42 = vld [vmem:[%s4175_s0 + $0x150] sm:$0xff]  ;;  %1200 = vadd.xlane.f32.xlu1 %v1199_v47  ;;  %1721 = vmatprep.subr.bf16.mxu1 %v4339_v22 }
  0x63   :  { %4395 = vst [vmem:[#allocation105_spill] sm:$0xff] %v2555_v28  ;;  %4396 = vst [vmem:[#allocation106_spill] sm:$0xff] %v2557_v53  ;;  %v2603_v53 = vmul.f32 %v1940_v48, %v2589_v31  ;;  %v2605_v28 = vld [vmem:[#allocation2 + $0x140] sm:$0xff]  ;;  %1197 = vadd.xlane.f32.xlu0 %v1196_v50  ;;  %1675 = vmatpush1.bf16.msra.mxu0 %v1962_v58 }
  0x64   :  { %4397 = vst [vmem:[#allocation107_spill] sm:$0xff] %v2565_v25  ;;  %4398 = vst [vmem:[#allocation108_spill] sm:$0xff] %v2577_v61  ;;  %v2637_v25 = vmul.f32 %v1940_v48, %v2631_v42  ;;  %1723 = vmatpush1.bf16.msra.mxu1 %v1962_v58  ;;  %1676 = vmatprep.subr.bf16.mxu0 %v4339_v22 }
  0x65   :  { %4399 = vst [vmem:[#allocation109_spill] sm:$0xff] %v2579_v33  ;;  %4400 = vst [vmem:[#allocation110_spill] sm:$0xff] %v2584_v0  ;;  %v2618_v0 = vmul.f32 %v1940_v48, %v2605_v28  ;;  %v2626_v33 = vmul.f32 %v1933_v23, %v2612_v54  ;;  %1724 = vmatprep.subr.bf16.mxu1 %v4339_v22  ;;  %v2854_v58 = vadd.f32 %v2599_v30, %v2603_v53 }
  0x66   :  { %4401 = vst [vmem:[#allocation111_spill] sm:$0xff] %v2589_v31  ;;  %4402 = vst [vmem:[#allocation112_spill] sm:$0xff] %v2595_v63  ;;  %v2622_v31 = vmul.f32 %v1933_v23, %v2607_v51  ;;  %v2633_v63 = vld [vmem:[#allocation2 + $0x150] sm:$0xff] }
  0x67   :  { %4403 = vst [vmem:[#allocation113_spill] sm:$0xff] %v2605_v28  ;;  %4404 = vst [vmem:[#allocation114_spill] sm:$0xff] %v2607_v51  ;;  %v2639_v28 = vld [vmem:[#allocation2 + $0x168] sm:$0xff]  ;;  %v2649_v51 = vld [vmem:[%s4175_s0 + $0x160] sm:$0xff]  ;;  %v2657_v47 = vmul.f32 %v1940_v48, %v2633_v63  ;;  %1678 = vmatpush1.bf16.msra.mxu0 %v1964_v59 }
  0x68   :  { %4405 = vst [vmem:[#allocation115_spill] sm:$0xff] %v2612_v54  ;;  %4406 = vst [vmem:[#allocation116_spill] sm:$0xff] %v2618_v0  ;;  %v2644_v54 = vld [vmem:[%s4175_s0 + $0x168] sm:$0xff]  ;;  %v1205_v0 = vadd.f32 %v2292_v19, %v2316_v62  ;;  %v2661_v50 = vmul.f32 %v1933_v23, %v2639_v28  ;;  %v2669_v61 = vmul.f32 %v1940_v48, %v2649_v51  ;;  %v2671_v62 = vld [vmem:[#allocation2 + $0x160] sm:$0xff]  ;;  %1726 = vmatpush1.bf16.msra.mxu1 %v1964_v59 }
  0x69   :  { %4407 = vst [vmem:[#allocation117_spill] sm:$0xff] %v2622_v31  ;;  %4408 = vst [vmem:[#allocation118_spill] sm:$0xff] %v2631_v42  ;;  %v1202_v42 = vadd.f32 %v2267_v17, %v2275_v18  ;;  %v2665_v31 = vmul.f32 %v1933_v23, %v2644_v54  ;;  %v2673_v19 = vld [vmem:[#allocation2 + $0x178] sm:$0xff]  ;;  %v2684_v17 = vmul.f32 %v1940_v48, %v2671_v62 }
  0x6a   :  { %4409 = vst [vmem:[#allocation119_spill] sm:$0xff] %v2633_v63  ;;  %4410 = vst [vmem:[#allocation120_spill] sm:$0xff] %v2639_v28  ;;  %v2678_v18 = vld [vmem:[%s4175_s0 + $0x178] sm:$0xff]  ;;  %v2697_v28 = vld [vmem:[%s4175_s0 + $0x170] sm:$0xff]  ;;  %1206 = vadd.xlane.f32.xlu1 %v1205_v0  ;;  %v2913_v59 = vadd.f32 %v2105_v38, %v2129_v44  ;;  %382 = vmatmul.mubr.f32.vlgmr.msra.gmra.mrb[0].mxu0 %v2029_v14 }
  0x6b   :  { %4411 = vst [vmem:[#allocation121_spill] sm:$0xff] %v2644_v54  ;;  %4412 = vst [vmem:[#allocation122_spill] sm:$0xff] %v2649_v51  ;;  %v2688_v51 = vmul.f32 %v1933_v23, %v2673_v19  ;;  %v2692_v54 = vmul.f32 %v1933_v23, %v2678_v18  ;;  %v2699_v63 = vld [vmem:[#allocation2 + $0x170] sm:$0xff]  ;;  %1203 = vadd.xlane.f32.xlu0 %v1202_v42  ;;  %703 = vmatmul.mubr.f32.vlgmr.msra.gmra.mrb[0].mxu1 %v1956_v56  ;;  %v4453_v14 = vld [vmem:[#allocation53_spill] sm:$0xff] }
  0x6c   :  { %4413 = vst [vmem:[#allocation123_spill] sm:$0xff] %v2665_v31  ;;  %4414 = vst [vmem:[#allocation124_spill] sm:$0xff] %v2669_v61  ;;  %v2720_v31 = vld [vmem:[%s4175_s0 + $0x188] sm:$0xff]  ;;  %v1211_v61 = vadd.f32 %v2363_v2, %v2371_v8  ;;  %v1217_v2 = vadd.f32 %v2422_v5, %v2441_v37  ;;  %v2756_v8 = vld [vmem:[%s4175_s0 + $0x198] sm:$0xff] }
  0x6d   :  { %4415 = vst [vmem:[#allocation125_spill] sm:$0xff] %v2671_v62  ;;  %4416 = vst [vmem:[#allocation126_spill] sm:$0xff] %v2673_v19  ;;  %v2707_v19 = vmul.f32 %v1940_v48, %v2697_v28  ;;  %v2715_v62 = vmul.f32 %v1933_v23, %v2701_v55  ;;  %v2761_v0 = vld [vmem:[%s4175_s0 + $0x190] sm:$0xff]  ;;  %v2769_v5 = vmul.f32 %v1933_v23, %v2756_v8  ;;  %v4454_v56 = vld [vmem:[#allocation74_spill] sm:$0xff] }
  0x6e   :  { %4417 = vst [vmem:[#allocation127_spill] sm:$0xff] %v2678_v18  ;;  %4418 = vst [vmem:[#allocation128_spill] sm:$0xff] %v2692_v54  ;;  %v2711_v18 = vmul.f32 %v1940_v48, %v2699_v63  ;;  %v2735_v54 = vld [vmem:[#allocation2 + $0x180] sm:$0xff]  ;;  %v2773_v37 = vmul.f32 %v1940_v48, %v2761_v0  ;;  %1212 = vadd.xlane.f32.xlu1 %v1211_v61  ;;  %v2824_v61 = vld [vmem:[%s4175_s0 + $0x1e8] sm:$0xff] }
  0x6f   :  { %4419 = vst [vmem:[#allocation129_spill] sm:$0xff] %v2697_v28  ;;  %4420 = vst [vmem:[#allocation130_spill] sm:$0xff] %v2699_v63  ;;  %v1208_v28 = vadd.f32 %v2324_v12, %v2343_v40  ;;  %v2728_v63 = vmul.f32 %v1933_v23, %v2720_v31  ;;  %v2745_v12 = vmul.f32 %v1940_v48, %v2735_v54  ;;  %v4457_v44 = vld [vmem:[#allocation65_spill] sm:$0xff] }
  0x70   :  { %4421 = vst [vmem:[#allocation131_spill] sm:$0xff] %v2701_v55  ;;  %4422 = vst [vmem:[#allocation132_spill] sm:$0xff] %v2707_v19  ;;  %v2733_v55 = vld [vmem:[%s4175_s0 + $0x180] sm:$0xff]  ;;  %v2737_v19 = vld [vmem:[#allocation2 + $0x198] sm:$0xff] }
  0x71   :  { %4423 = vst [vmem:[#allocation133_spill] sm:$0xff] %v2720_v31  ;;  %4424 = vst [vmem:[#allocation134_spill] sm:$0xff] %v2728_v63  ;;  %v2741_v42 = vmul.f32 %v1940_v48, %v2733_v55  ;;  %v2749_v40 = vmul.f32 %v1933_v23, %v2737_v19  ;;  %1209 = vadd.xlane.f32.xlu0 %v1208_v28  ;;  %v1220_v31 = vadd.f32 %v2456_v3, %v2480_v60  ;;  %v2805_v63 = vld [vmem:[#allocation2 + $0x1b0] sm:$0xff] }
  0x72   :  { %4425 = vst [vmem:[#allocation135_spill] sm:$0xff] %v2733_v55  ;;  %4426 = vst [vmem:[#allocation136_spill] sm:$0xff] %v2735_v54  ;;  %v2775_v54 = vld [vmem:[#allocation2 + $0x190] sm:$0xff]  ;;  %v2777_v55 = vld [vmem:[#allocation2 + $0x1a8] sm:$0xff]  ;;  %v1226_v28 = vadd.f32 %v2533_v45, %v2537_v46  ;;  %v2815_v60 = vmul.f32 %v1940_v48, %v2805_v63  ;;  %v2835_v46 = vadd.f32 %v2626_v33, %v2637_v25  ;;  %1218 = vadd.xlane.f32.xlu1 %v1217_v2 }
  0x73   :  { %4427 = vst [vmem:[#allocation137_spill] sm:$0xff] %v2737_v19  ;;  %4428 = vst [vmem:[#allocation138_spill] sm:$0xff] %v2741_v42  ;;  %v1214_v19 = vadd.f32 %v2390_v4, %v2414_v20  ;;  %v2783_v57 = vmul.f32 %v1940_v48, %v2775_v54  ;;  %v2787_v4 = vmul.f32 %v1933_v23, %v2777_v55  ;;  %v2837_v45 = vld [vmem:[#allocation2 + $0x1c0] sm:$0xff]  ;;  %v2858_v33 = vld [vmem:[#allocation2 + $0x1d0] sm:$0xff] }
  0x74   :  { %4429 = vst [vmem:[#allocation139_spill] sm:$0xff] %v2756_v8  ;;  %4430 = vst [vmem:[#allocation140_spill] sm:$0xff] %v2761_v0  ;;  %v1223_v20 = vadd.f32 %v2488_v10, %v2507_v43  ;;  %v2791_v0 = vld [vmem:[#allocation2 + $0x1a0] sm:$0xff]  ;;  %v2793_v8 = vld [vmem:[#allocation2 + $0x1b8] sm:$0xff]  ;;  %v1229_v43 = vadd.f32 %v2569_v13, %v2573_v52  ;;  %v1421_v25 = vmul.f32 %v1940_v48, %v2837_v45 }
  0x75   :  { %4431 = vst [vmem:[#allocation141_spill] sm:$0xff] %v2769_v5  ;;  %4432 = vst [vmem:[#allocation142_spill] sm:$0xff] %v2775_v54  ;;  %v2799_v54 = vmul.f32 %v1940_v48, %v2791_v0  ;;  %v2807_v10 = vld [vmem:[#allocation2 + $0x1c8] sm:$0xff]  ;;  %v2829_v52 = vld [vmem:[%s4175_s0 + $0x1e0] sm:$0xff]  ;;  %1215 = vadd.xlane.f32.xlu0 %v1214_v19  ;;  %v1423_v53 = vmul.f32 %v1940_v48, %v2858_v33 }
  0x76   :  { %4433 = vst [vmem:[#allocation143_spill] sm:$0xff] %v2777_v55  ;;  %4434 = vst [vmem:[#allocation144_spill] sm:$0xff] %v2791_v0  ;;  %v2803_v55 = vmul.f32 %v1933_v23, %v2793_v8  ;;  %v2819_v3 = vmul.f32 %v1933_v23, %v2807_v10  ;;  %v2839_v13 = vld [vmem:[#allocation2 + $0x1d8] sm:$0xff]  ;;  %v2877_v42 = vld [vmem:[%s4175_s0 + $0x1f0] sm:$0xff]  ;;  %1224 = vadd.xlane.f32.xlu1 %v1223_v20 }
  0x77   :  { %4435 = vst [vmem:[#allocation145_spill] sm:$0xff] %v2793_v8  ;;  %4436 = vst [vmem:[#allocation146_spill] sm:$0xff] %v2805_v63  ;;  %v1168_v63 = vmul.f32 %v1940_v48, %v2829_v52  ;;  %v2848_v8 = vld [vmem:[%s4175_s0 + $0x1f8] sm:$0xff]  ;;  %v1424_v22 = vmul.f32 %v1933_v23, %v2839_v13  ;;  %v2879_v5 = vld [vmem:[#allocation2 + $0x1f0] sm:$0xff] }
  0x78   :  { %4437 = vst [vmem:[#allocation147_spill] sm:$0xff] %v2807_v10  ;;  %4438 = vst [vmem:[#allocation148_spill] sm:$0xff] %v2824_v61  ;;  %v1169_v10 = vmul.f32 %v1933_v23, %v2824_v61  ;;  %v2860_v61 = vld [vmem:[#allocation2 + $0x1e8] sm:$0xff]  ;;  %v1171_v0 = vmul.f32 %v1933_v23, %v2848_v8 }
  0x79   :  { %4439 = vst [vmem:[#allocation149_spill] sm:$0xff] %v2829_v52  ;;  %4440 = vst [vmem:[#allocation150_spill] sm:$0xff] %v2837_v45  ;;  %v2862_v52 = vld [vmem:[#allocation2 + $0x1e0] sm:$0xff]  ;;  %v1426_v30 = vmul.f32 %v1933_v23, %v2860_v61  ;;  %v2872_v45 = vld [vmem:[#allocation2 + $0x1f8] sm:$0xff]  ;;  %1221 = vadd.xlane.f32.xlu0 %v1220_v31 }
  0x7a   :  { %4441 = vst [vmem:[#allocation151_spill] sm:$0xff] %v2839_v13  ;;  %4442 = vst [vmem:[#allocation152_spill] sm:$0xff] %v2848_v8  ;;  %v1425_v19 = vmul.f32 %v1940_v48, %v2862_v52  ;;  %v1428_v2 = vmul.f32 %v1933_v23, %v2872_v45  ;;  %v1170_v8 = vmul.f32 %v1940_v48, %v2877_v42  ;;  %v4464_v20 = vld [vmem:[#allocation91_spill] sm:$0xff]  ;;  %1230 = vadd.xlane.f32.xlu1 %v1229_v43 }
  0x7b   :  { %4443 = vst [vmem:[#allocation153_spill] sm:$0xff] %v2858_v33  ;;  %4444 = vst [vmem:[#allocation154_spill] sm:$0xff] %v2860_v61  ;;  %v1427_v61 = vmul.f32 %v1940_v48, %v2879_v5  ;;  %v2891_v33 = vadd.f32 %v1169_v10, %v1168_v63  ;;  %v2895_v13 = vadd.f32 %v2005_v7, %v2013_v9  ;;  %v4462_v63 = vld [vmem:[#allocation96_spill] sm:$0xff]  ;;  %v4465_v10 = vld [vmem:[#allocation90_spill] sm:$0xff] }
  0x7c   :  { %4445 = vst [vmem:[#allocation155_spill] sm:$0xff] %v2862_v52  ;;  %4446 = vst [vmem:[#allocation156_spill] sm:$0xff] %v2872_v45  ;;  %v2899_v52 = vadd.f32 %v1936_v36, %v1983_v1  ;;  %v2901_v45 = vadd.f32 %v1171_v0, %v1170_v8  ;;  %v2917_v36 = vadd.f32 %v2080_v29, %v2097_v35  ;;  %v4451_v29 = vld [vmem:[#allocation15_spill] sm:$0xff]  ;;  %v4452_v35 = vld [vmem:[#allocation57_spill] sm:$0xff] }
  0x7d   :  { %4447 = vst [vmem:[#allocation157_spill] sm:$0xff] %v2877_v42  ;;  %4448 = vst [vmem:[#allocation158_spill] sm:$0xff] %v2879_v5  ;;  %v2905_v42 = vadd.f32 %v2054_v21, %v2060_v24  ;;  %v2909_v5 = vadd.f32 %v2033_v15, %v2037_v16  ;;  %v2921_v1 = vadd.f32 %v2176_v49, %v2194_v39  ;;  %v4449_v16 = vld [vmem:[#allocation58_spill] sm:$0xff]  ;;  %707 = vmatprep.mubr.f32.mxu1 %v4451_v29  ;;  %v4459_v49 = vld [vmem:[#allocation83_spill] sm:$0xff] }
  0x7e   :  { %v2925_v7 = vadd.f32 %v2148_v6, %v2156_v41  ;;  %v2931_v9 = vadd.f32 %v2243_v34, %v2251_v26  ;;  %v2935_v15 = vadd.f32 %v2202_v27, %v2224_v32  ;;  %v2939_v21 = vadd.f32 %v4449_v16, %v2320_v11  ;;  %v4450_v24 = vld [vmem:[#allocation14_spill] sm:$0xff]  ;;  %v4458_v32 = vld [vmem:[#allocation84_spill] sm:$0xff]  ;;  %v4460_v6 = vld [vmem:[#allocation79_spill] sm:$0xff]  ;;  %1227 = vadd.xlane.f32.xlu0 %v1226_v28 }
  0x7f   :  { %386 = vmatprep.mubr.f32.mxu0 %v4450_v24  ;;  %v2945_v38 = vadd.f32 %v4453_v14, %v4452_v35  ;;  %v4455_v39 = vld [vmem:[#allocation70_spill] sm:$0xff]  ;;  %v2957_v11 = vadd.f32 %v4459_v49, %v4458_v32  ;;  %v4461_v34 = vld [vmem:[#allocation75_spill] sm:$0xff]  ;;  %v2969_v16 = vadd.f32 %v4465_v10, %v4464_v20  ;;  %v4466_v24 = vld [vmem:[#allocation108_spill] sm:$0xff]  ;;  %v2991_v28 = vadd.f32 %v2688_v51, %v2711_v18 }
  0x80   :  { %v2949_v26 = vadd.f32 %v4455_v39, %v4454_v56  ;;  %v4456_v41 = vld [vmem:[#allocation66_spill] sm:$0xff]  ;;  %v2961_v31 = vadd.f32 %v4461_v34, %v4460_v6  ;;  %v4463_v8 = vld [vmem:[#allocation95_spill] sm:$0xff]  ;;  %v4469_v56 = vld [vmem:[#allocation100_spill] sm:$0xff]  ;;  %v3001_v20 = vadd.f32 %v2749_v40, %v2783_v57  ;;  %v3005_v10 = vadd.f32 %v2715_v62, %v2745_v12  ;;  %1236 = vadd.xlane.f32.xlu1 %v2835_v46 }
  0x81   :  { %v2953_v27 = vadd.f32 %v4457_v44, %v4456_v41  ;;  %v2965_v0 = vadd.f32 %v4463_v8, %v4462_v63  ;;  %v4467_v29 = vld [vmem:[#allocation107_spill] sm:$0xff]  ;;  %v4470_v41 = vld [vmem:[#allocation117_spill] sm:$0xff]  ;;  %v4472_v49 = vld [vmem:[#allocation18_spill] sm:$0xff]  ;;  %v2995_v63 = vadd.f32 %v2661_v50, %v2684_v17  ;;  %v3009_v51 = vadd.f32 %v2803_v55, %v2815_v60 }
  0x82   :  { %v2973_v35 = vadd.f32 %v4467_v29, %v4466_v24  ;;  %v4468_v14 = vld [vmem:[#allocation103_spill] sm:$0xff]  ;;  %v2981_v44 = vadd.f32 %v4470_v41, %v2657_v47  ;;  %v4471_v32 = vld [vmem:[#allocation17_spill] sm:$0xff]  ;;  %708 = vmatmul.mubr.f32.gmra.mrb[2].mxu1 %v4472_v49  ;;  %v4473_v6 = vld [vmem:[#allocation116_spill] sm:$0xff]  ;;  %v3013_v50 = vadd.f32 %v2787_v4, %v2799_v54  ;;  %v3015_v18 = vadd.f32 %v1424_v22, %v1423_v53 }
  0x83   :  { %v2977_v39 = vadd.f32 %v4469_v56, %v4468_v14  ;;  %387 = vmatmul.mubr.f32.gmra.mrb[2].mxu0 %v4471_v32  ;;  %v4474_v34 = vld [vmem:[#allocation112_spill] sm:$0xff]  ;;  %v4475_v8 = vld [vmem:[#allocation19_spill] sm:$0xff]  ;;  %v3018_v17 = vadd.f32 %v2819_v3, %v1421_v25  ;;  %v3020_v24 = vadd.f32 %v1428_v2, %v1427_v61  ;;  %1233 = vadd.xlane.f32.xlu0 %v2854_v58  ;;  %v4482_v4 = vld [vmem:[#allocation21_spill] sm:$0xff] }
  0x84   :  { %v2987_v43 = vadd.f32 %v4474_v34, %v4473_v6  ;;  %391 = vmatprep.mubr.f32.mxu0 %v4475_v8  ;;  %v4476_v47 = vld [vmem:[#allocation20_spill] sm:$0xff]  ;;  %v4480_v57 = vld [vmem:[#allocation123_spill] sm:$0xff]  ;;  %v3028_v29 = vadd.f32 %v1426_v30, %v1425_v19  ;;  %v4483_v3 = vld [vmem:[#allocation22_spill] sm:$0xff] }
  0x85   :  { %712 = vmatprep.mubr.f32.mxu1 %v4476_v47  ;;  %v4477_v62 = vld [vmem:[#allocation132_spill] sm:$0xff]  ;;  %v4484_v61 = vld [vmem:[#allocation23_spill] sm:$0xff]  ;;  %v3042_v58 = vld [vmem:[%s4175_s0 + $0x1a0] sm:$0xff] }
  0x86   :  { %v4478_v12 = vld [vmem:[#allocation128_spill] sm:$0xff]  ;;  %713 = vmatmul.mubr.f32.gmra.mrb[4].mxu1 %v4482_v4  ;;  %v3037_v46 = vld [vmem:[%s4175_s0 + $0x1a8] sm:$0xff]  ;;  %v3047_v25 = vld [vmem:[%s4175_s0 + $0x1b8] sm:$0xff]  ;;  %v1160_v53 = vmul.f32 %v1940_v48, %v3042_v58 }
  0x87   :  { %v1241_v40 = vadd.f32 %v4478_v12, %v4477_v62  ;;  %v4479_v55 = vld [vmem:[#allocation124_spill] sm:$0xff]  ;;  %717 = vmatprep.mubr.f32.mxu1 %v4484_v61  ;;  %v1161_v22 = vmul.f32 %v1933_v23, %v3037_v46  ;;  %v1163_v30 = vmul.f32 %v1933_v23, %v3047_v25  ;;  %v4485_v14 = vld [vmem:[#allocation141_spill] sm:$0xff]  ;;  %v4486_v41 = vld [vmem:[#allocation138_spill] sm:$0xff] }
  0x88   :  { %v1238_v60 = vadd.f32 %v4480_v57, %v4479_v55  ;;  %v4481_v54 = vld [vmem:[#allocation16_spill] sm:$0xff]  ;;  %v1247_v56 = vadd.f32 %v4485_v14, %v2773_v37  ;;  %v4487_v32 = vld [vmem:[#allocation134_spill] sm:$0xff]  ;;  %v4489_v34 = vld [vmem:[#allocation25_spill] sm:$0xff] }
  0x89   :  { %392 = vmatmul.mubr.f32.gmra.mrb[4].mxu0 %v4481_v54  ;;  %v3058_v19 = vld [vmem:[%s4175_s0 + $0x1b0] sm:$0xff]  ;;  %1242 = vadd.xlane.f32.xlu1 %v1241_v40  ;;  %v1244_v49 = vadd.f32 %v4487_v32, %v4486_v41  ;;  %v4490_v8 = vld [vmem:[#allocation26_spill] sm:$0xff]  ;;  %v4491_v47 = vld [vmem:[#allocation27_spill] sm:$0xff] }
  0x8a   :  { %396 = vmatprep.mubr.f32.mxu0 %v4483_v3  ;;  %v1162_v2 = vmul.f32 %v1940_v48, %v3058_v19  ;;  %1239 = vadd.xlane.f32.xlu0 %v1238_v60  ;;  %v4488_v6 = vld [vmem:[#allocation24_spill] sm:$0xff]  ;;  %v3073_v62 = vld [vmem:[%s4175_s0 + $0x1c8] sm:$0xff]  ;;  %v3078_v37 = vld [vmem:[%s4175_s0 + $0x1c0] sm:$0xff]  ;;  %v1250_v3 = vadd.f32 %v1161_v22, %v1160_v53 }
  0x8b   :  { %718 = vmatmul.mubr.f32.gmra.mrb[6].mxu1 %v4489_v34  ;;  %v3083_v12 = vld [vmem:[%s4175_s0 + $0x1d8] sm:$0xff]  ;;  %v1165_v40 = vmul.f32 %v1933_v23, %v3073_v62  ;;  %v1164_v55 = vmul.f32 %v1940_v48, %v3078_v37  ;;  %v3094_v60 = vld [vmem:[%s4175_s0 + $0x1d0] sm:$0xff]  ;;  %v4494_v41 = vld [vmem:[#allocation30_spill] sm:$0xff] }
  0x8c   :  { %722 = vmatprep.mubr.f32.mxu1 %v4491_v47  ;;  %v1167_v57 = vmul.f32 %v1933_v23, %v3083_v12  ;;  %v1166_v54 = vmul.f32 %v1940_v48, %v3094_v60  ;;  %v1253_v4 = vadd.f32 %v1163_v30, %v1162_v2  ;;  %v4492_v61 = vld [vmem:[#allocation28_spill] sm:$0xff]  ;;  %v4493_v14 = vld [vmem:[#allocation29_spill] sm:$0xff]  ;;  %v4495_v32 = vld [vmem:[#allocation31_spill] sm:$0xff] }
  0x8d   :  { %397 = vmatmul.mubr.f32.gmra.mrb[6].mxu0 %v4488_v6  ;;  %1248 = vadd.xlane.f32.xlu1 %v1247_v56  ;;  %v1256_v6 = vadd.f32 %v1165_v40, %v1164_v55  ;;  %v4496_v34 = vld [vmem:[#allocation32_spill] sm:$0xff]  ;;  %v4498_v48 = vld [vmem:[#allocation34_spill] sm:$0xff]  ;;  %v4499_v30 = vld [vmem:[#allocation35_spill] sm:$0xff] }
  0x8e   :  { %401 = vmatprep.mubr.f32.mxu0 %v4490_v8  ;;  %1245 = vadd.xlane.f32.xlu0 %v1244_v49  ;;  %v1259_v23 = vadd.f32 %v1167_v57, %v1166_v54  ;;  %v4497_v8 = vld [vmem:[#allocation33_spill] sm:$0xff]  ;;  %v4500_v22 = vld [vmem:[#allocation36_spill] sm:$0xff]  ;;  %v4502_v2 = vld [vmem:[#allocation38_spill] sm:$0xff] }
  0x8f   :  { %723 = vmatmul.mubr.f32.gmra.mrb[8].mxu1 %v4493_v14  ;;  %v4501_v53 = vld [vmem:[#allocation37_spill] sm:$0xff]  ;;  %v4503_v56 = vld [vmem:[#allocation39_spill] sm:$0xff]  ;;  %v4504_v49 = vld [vmem:[#allocation40_spill] sm:$0xff] }
  0x90   :  { %727 = vmatprep.mubr.f32.mxu1 %v4495_v32  ;;  %v4505_v47 = vld [vmem:[#allocation41_spill] sm:$0xff]  ;;  %v4506_v40 = vld [vmem:[#allocation42_spill] sm:$0xff]  ;;  %v4507_v55 = vld [vmem:[#allocation43_spill] sm:$0xff] }
  0x91   :  { %402 = vmatmul.mubr.f32.gmra.mrb[8].mxu0 %v4492_v61  ;;  %1254 = vadd.xlane.f32.xlu1 %v1253_v4  ;;  %v4508_v57 = vld [vmem:[#allocation44_spill] sm:$0xff]  ;;  %v4509_v54 = vld [vmem:[#allocation45_spill] sm:$0xff]  ;;  %v4510_v4 = vld [vmem:[#allocation46_spill] sm:$0xff] }
  0x92   :  { %406 = vmatprep.mubr.f32.mxu0 %v4494_v41  ;;  %1251 = vadd.xlane.f32.xlu0 %v1250_v3  ;;  %v4513_v3 = vld [vmem:[#allocation49_spill] sm:$0xff]  ;;  %v4514_v61 = vld [vmem:[#allocation50_spill] sm:$0xff]  ;;  %v4518_v41 = vld [vmem:[#allocation55_spill] sm:$0xff] }
  0x93   :  { %728 = vmatmul.mubr.f32.gmra.mrb[10].mxu1 %v4497_v8  ;;  %v4517_v14 = vld [vmem:[#allocation54_spill] sm:$0xff]  ;;  %v4521_v32 = vld [vmem:[#allocation60_spill] sm:$0xff]  ;;  %v4529_v8 = vld [vmem:[#allocation71_spill] sm:$0xff] }
  0x94   :  { %732 = vmatprep.mubr.f32.mxu1 %v4499_v30  ;;  %v4533_v30 = vld [vmem:[#allocation77_spill] sm:$0xff] }
  0x95   :  { %407 = vmatmul.mubr.f32.gmra.mrb[10].mxu0 %v4496_v34  ;;  %1260 = vadd.xlane.f32.xlu1 %v1259_v23  ;;  %v4522_v23 = vld [vmem:[#allocation61_spill] sm:$0xff]  ;;  %v4526_v34 = vld [vmem:[#allocation67_spill] sm:$0xff] }
  0x96   :  { %411 = vmatprep.mubr.f32.mxu0 %v4498_v48  ;;  %1257 = vadd.xlane.f32.xlu0 %v1256_v6  ;;  %v4525_v6 = vld [vmem:[#allocation64_spill] sm:$0xff] }
  0x97   :  { %733 = vmatmul.mubr.f32.gmra.mrb[12].mxu1 %v4501_v53  ;;  %v4530_v48 = vld [vmem:[#allocation72_spill] sm:$0xff]  ;;  %v4537_v53 = vld [vmem:[#allocation82_spill] sm:$0xff] }
  0x98   :  { %737 = vmatprep.mubr.f32.mxu1 %v4503_v56  ;;  %v4541_v56 = vld [vmem:[#allocation88_spill] sm:$0xff] }
  0x99   :  { %412 = vmatmul.mubr.f32.gmra.mrb[12].mxu0 %v4500_v22  ;;  %1266 = vadd.xlane.f32.xlu1 %v2901_v45  ;;  %v4511_v45 = vld [vmem:[#allocation47_spill] sm:$0xff]  ;;  %v4534_v22 = vld [vmem:[#allocation78_spill] sm:$0xff] }
  0x9a   :  { %416 = vmatprep.mubr.f32.mxu0 %v4502_v2  ;;  %1263 = vadd.xlane.f32.xlu0 %v2891_v33  ;;  %v4512_v33 = vld [vmem:[#allocation48_spill] sm:$0xff]  ;;  %v4538_v2 = vld [vmem:[#allocation85_spill] sm:$0xff] }
  0x9b   :  { %738 = vmatmul.mubr.f32.gmra.mrb[14].mxu1 %v4505_v47  ;;  %v4545_v47 = vld [vmem:[#allocation94_spill] sm:$0xff] }
  0x9c   :  { %742 = vmatprep.mubr.f32.mxu1 %v4507_v55  ;;  %v4549_v55 = vld [vmem:[#allocation101_spill] sm:$0xff] }
  0x9d   :  { %417 = vmatmul.mubr.f32.gmra.mrb[14].mxu0 %v4504_v49  ;;  %1433 = vadd.xlane.f32.xlu1 %v2895_v13  ;;  %v4515_v13 = vld [vmem:[#allocation51_spill] sm:$0xff]  ;;  %v4542_v49 = vld [vmem:[#allocation89_spill] sm:$0xff] }
  0x9e   :  { %421 = vmatprep.mubr.f32.mxu0 %v4506_v40  ;;  %1430 = vadd.xlane.f32.xlu0 %v2899_v52  ;;  %v4516_v52 = vld [vmem:[#allocation52_spill] sm:$0xff]  ;;  %v4546_v40 = vld [vmem:[#allocation97_spill] sm:$0xff] }
  0x9f   :  { %743 = vmatmul.mubr.f32.gmra.mrb[16].mxu1 %v4509_v54  ;;  %v4553_v54 = vld [vmem:[#allocation106_spill] sm:$0xff] }
  0xa0   :  { %747 = vmatprep.mubr.f32.mxu1 %v4511_v45  ;;  %v4555_v45 = vld [vmem:[#allocation110_spill] sm:$0xff] }
  0xa1   :  { %422 = vmatmul.mubr.f32.gmra.mrb[16].mxu0 %v4508_v57  ;;  %1439 = vadd.xlane.f32.xlu1 %v2905_v42  ;;  %v4519_v42 = vld [vmem:[#allocation56_spill] sm:$0xff]  ;;  %v4550_v57 = vld [vmem:[#allocation102_spill] sm:$0xff] }
  0xa2   :  { %426 = vmatprep.mubr.f32.mxu0 %v4510_v4  ;;  %1436 = vadd.xlane.f32.xlu0 %v2909_v5  ;;  %v4520_v5 = vld [vmem:[#allocation59_spill] sm:$0xff]  ;;  %v4554_v4 = vld [vmem:[#allocation109_spill] sm:$0xff] }
  0xa3   :  { %748 = vmatmul.mubr.f32.gmra.mrb[18].mxu1 %v4513_v3  ;;  %v933_v3 = vld [vmem:[%s4179_s4 + $0x8] sm:$0xff] }
  0xa4   :  { %752 = vmatprep.mubr.f32.mxu1 %v4515_v13  ;;  %v4559_v13 = vld [vmem:[#allocation115_spill] sm:$0xff]  ;;  %966 = vst.msk [vmem:[%s4183_s8 + $0x8] sm:$0xff] %vm964_vm0, %v933_v3  ;;  %v4587_v3 = vld [vmem:[#allocation148_spill] sm:$0xff] }
  0xa5   :  { %427 = vmatmul.mubr.f32.gmra.mrb[18].mxu0 %v4512_v33  ;;  %1445 = vadd.xlane.f32.xlu1 %v2913_v59  ;;  %v4523_v59 = vld [vmem:[#allocation62_spill] sm:$0xff]  ;;  %v935_v33 = vld [vmem:[%s4179_s4 + $0x18] sm:$0xff] }
  0xa6   :  { %431 = vmatprep.mubr.f32.mxu0 %v4514_v61  ;;  %1442 = vadd.xlane.f32.xlu0 %v2917_v36  ;;  %v4524_v36 = vld [vmem:[#allocation63_spill] sm:$0xff]  ;;  %v4558_v61 = vld [vmem:[#allocation114_spill] sm:$0xff]  ;;  %968 = vst.msk [vmem:[%s4183_s8 + $0x18] sm:$0xff] %vm964_vm0, %v935_v33 }
  0xa7   :  { %753 = vmatmul.mubr.f32.gmra.mrb[20].mxu1 %v4517_v14  ;;  %v4562_v14 = vld [vmem:[#allocation120_spill] sm:$0xff]  ;;  %v4586_v33 = vld [vmem:[#allocation154_spill] sm:$0xff] }
  0xa8   :  { %757 = vmatprep.mubr.f32.mxu1 %v4519_v42  ;;  %v4565_v42 = vld [vmem:[#allocation125_spill] sm:$0xff] }
  0xa9   :  { %432 = vmatmul.mubr.f32.gmra.mrb[20].mxu0 %v4516_v52  ;;  %1451 = vadd.xlane.f32.xlu1 %v2921_v1  ;;  %v4527_v1 = vld [vmem:[#allocation68_spill] sm:$0xff]  ;;  %v937_v52 = vld [vmem:[%s4179_s4 + $0x28] sm:$0xff] }
  0xaa   :  { %436 = vmatprep.mubr.f32.mxu0 %v4518_v41  ;;  %1448 = vadd.xlane.f32.xlu0 %v2925_v7  ;;  %v4528_v7 = vld [vmem:[#allocation69_spill] sm:$0xff]  ;;  %970 = vst.msk [vmem:[%s4183_s8 + $0x28] sm:$0xff] %vm964_vm0, %v937_v52 }
  0xab   :  { %758 = vmatmul.mubr.f32.gmra.mrb[22].mxu1 %v4521_v32  ;;  %v4563_v41 = vld [vmem:[#allocation121_spill] sm:$0xff]  ;;  %v4566_v32 = vld [vmem:[#allocation126_spill] sm:$0xff] }
  0xac   :  { %762 = vmatprep.mubr.f32.mxu1 %v4523_v59  ;;  %v4569_v59 = vld [vmem:[#allocation130_spill] sm:$0xff]  ;;  %v4588_v52 = vld [vmem:[#allocation149_spill] sm:$0xff] }
  0xad   :  { %437 = vmatmul.mubr.f32.gmra.mrb[22].mxu0 %v4520_v5  ;;  %1457 = vadd.xlane.f32.xlu1 %v2931_v9  ;;  %v4531_v9 = vld [vmem:[#allocation73_spill] sm:$0xff] }
  0xae   :  { %441 = vmatprep.mubr.f32.mxu0 %v4522_v23  ;;  %1454 = vadd.xlane.f32.xlu0 %v2935_v15  ;;  %v4532_v15 = vld [vmem:[#allocation76_spill] sm:$0xff]  ;;  %v939_v5 = vld [vmem:[%s4179_s4 + $0x38] sm:$0xff]  ;;  %v4567_v23 = vld [vmem:[#allocation127_spill] sm:$0xff] }
  0xaf   :  { %763 = vmatmul.mubr.f32.gmra.mrb[24].mxu1 %v4525_v6  ;;  %972 = vst.msk [vmem:[%s4183_s8 + $0x38] sm:$0xff] %vm964_vm0, %v939_v5  ;;  %v940_v6 = vld [vmem:[%s4179_s4 + $0x40] sm:$0xff]  ;;  %v4591_v5 = vld [vmem:[#allocation152_spill] sm:$0xff] }
  0xb0   :  { %767 = vmatprep.mubr.f32.mxu1 %v4527_v1  ;;  %v4571_v1 = vld [vmem:[#allocation133_spill] sm:$0xff]  ;;  %973 = vst.msk [vmem:[%s4183_s8 + $0x40] sm:$0xff] %vm964_vm0, %v940_v6  ;;  %v4593_v6 = vld [vmem:[#allocation158_spill] sm:$0xff] }
  0xb1   :  { %442 = vmatmul.mubr.f32.gmra.mrb[24].mxu0 %v4524_v36  ;;  %1463 = vadd.xlane.f32.xlu1 %v2939_v21  ;;  %v4535_v21 = vld [vmem:[#allocation80_spill] sm:$0xff]  ;;  %v941_v36 = vld [vmem:[%s4179_s4 + $0x48] sm:$0xff] }
  0xb2   :  { %446 = vmatprep.mubr.f32.mxu0 %v4526_v34  ;;  %1460 = vadd.xlane.f32.xlu0 %v2945_v38  ;;  %v4536_v38 = vld [vmem:[#allocation81_spill] sm:$0xff]  ;;  %v4570_v34 = vld [vmem:[#allocation131_spill] sm:$0xff]  ;;  %974 = vst.msk [vmem:[%s4183_s8 + $0x48] sm:$0xff] %vm964_vm0, %v941_v36 }
  0xb3   :  { %768 = vmatmul.mubr.f32.gmra.mrb[26].mxu1 %v4529_v8  ;;  %v942_v8 = vld [vmem:[%s4179_s4 + $0x50] sm:$0xff]  ;;  %v4592_v36 = vld [vmem:[#allocation157_spill] sm:$0xff] }
  0xb4   :  { %772 = vmatprep.mubr.f32.mxu1 %v4531_v9  ;;  %v4575_v9 = vld [vmem:[#allocation139_spill] sm:$0xff]  ;;  %975 = vst.msk [vmem:[%s4183_s8 + $0x50] sm:$0xff] %vm964_vm0, %v942_v8 }
  0xb5   :  { %447 = vmatmul.mubr.f32.gmra.mrb[26].mxu0 %v4528_v7  ;;  %1469 = vadd.xlane.f32.xlu1 %v2949_v26  ;;  %v4539_v26 = vld [vmem:[#allocation86_spill] sm:$0xff]  ;;  %v943_v7 = vld [vmem:[%s4179_s4 + $0x58] sm:$0xff] }
  0xb6   :  { %451 = vmatprep.mubr.f32.mxu0 %v4530_v48  ;;  %1466 = vadd.xlane.f32.xlu0 %v2953_v27  ;;  %v4540_v27 = vld [vmem:[#allocation87_spill] sm:$0xff]  ;;  %v4574_v48 = vld [vmem:[#allocation137_spill] sm:$0xff]  ;;  %976 = vst.msk [vmem:[%s4183_s8 + $0x58] sm:$0xff] %vm964_vm0, %v943_v7 }
  0xb7   :  { %773 = vmatmul.mubr.f32.gmra.mrb[28].mxu1 %v4533_v30  ;;  %v4577_v30 = vld [vmem:[#allocation142_spill] sm:$0xff] }
  0xb8   :  { %777 = vmatprep.mubr.f32.mxu1 %v4535_v21  ;;  %v4578_v21 = vld [vmem:[#allocation143_spill] sm:$0xff] }
  0xb9   :  { %452 = vmatmul.mubr.f32.gmra.mrb[28].mxu0 %v4532_v15  ;;  %1475 = vadd.xlane.f32.xlu1 %v2957_v11  ;;  %v4543_v11 = vld [vmem:[#allocation92_spill] sm:$0xff] }
  0xba   :  { %456 = vmatprep.mubr.f32.mxu0 %v4534_v22  ;;  %1472 = vadd.xlane.f32.xlu0 %v2961_v31  ;;  %v4544_v31 = vld [vmem:[#allocation93_spill] sm:$0xff]  ;;  %v4576_v15 = vld [vmem:[#allocation140_spill] sm:$0xff]  ;;  %v945_v22 = vld [vmem:[%s4179_s4 + $0x68] sm:$0xff] }
  0xbb   :  { %778 = vmatmul.mubr.f32.gmra.mrb[30].mxu1 %v4537_v53  ;;  %978 = vst.msk [vmem:[%s4183_s8 + $0x68] sm:$0xff] %vm964_vm0, %v945_v22  ;;  %v959_v22 = vld [vmem:[%s4179_s4 + $0xd8] sm:$0xff] }
  0xbc   :  { %782 = vmatprep.mubr.f32.mxu1 %v4539_v26  ;;  %v947_v26 = vld [vmem:[%s4179_s4 + $0x78] sm:$0xff]  ;;  %992 = vst.msk [vmem:[%s4183_s8 + $0xd8] sm:$0xff] %vm964_vm0, %v959_v22 }
  0xbd   :  { %457 = vmatmul.mubr.f32.gmra.mrb[30].mxu0 %v4536_v38  ;;  %1481 = vadd.xlane.f32.xlu1 %v2965_v0  ;;  %v4547_v0 = vld [vmem:[#allocation98_spill] sm:$0xff]  ;;  %980 = vst.msk [vmem:[%s4183_s8 + $0x78] sm:$0xff] %vm964_vm0, %v947_v26  ;;  %v1008_v22 = vld [vmem:[%s4180_s5 + $0x58] sm:$0xff] }
  0xbe   :  { %461 = vmatprep.mubr.f32.mxu0 %v4538_v2  ;;  %1478 = vadd.xlane.f32.xlu0 %v2969_v16  ;;  %v4548_v16 = vld [vmem:[#allocation99_spill] sm:$0xff]  ;;  %v944_v38 = vld [vmem:[%s4179_s4 + $0x60] sm:$0xff]  ;;  %1040 = vst.msk [vmem:[%s4184_s9 + $0x58] sm:$0xff] %vm964_vm0, %v1008_v22  ;;  %v1024_v22 = vld [vmem:[%s4180_s5 + $0xd8] sm:$0xff] }
  0xbf   :  { %783 = vmatmul.mubr.f32.gmra.mrb[32].mxu1 %v4541_v56  ;;  %977 = vst.msk [vmem:[%s4183_s8 + $0x60] sm:$0xff] %vm964_vm0, %v944_v38  ;;  %1056 = vst.msk [vmem:[%s4184_s9 + $0xd8] sm:$0xff] %vm964_vm0, %v1024_v22 }
  0xc0   :  { %787 = vmatprep.mubr.f32.mxu1 %v4543_v11  ;;  %v1068_v11 = vld [vmem:[%s4183_s8 + $0x18] sm:$0xff] }
  0xc1   :  { %462 = vmatmul.mubr.f32.gmra.mrb[32].mxu0 %v4540_v27  ;;  %1487 = vadd.xlane.f32.xlu1 %v2973_v35  ;;  %v4551_v35 = vld [vmem:[#allocation104_spill] sm:$0xff]  ;;  %v4580_v27 = vld [vmem:[#allocation145_spill] sm:$0xff] }
  0xc2   :  { %466 = vmatprep.mubr.f32.mxu0 %v4542_v49  ;;  %1484 = vadd.xlane.f32.xlu0 %v2977_v39  ;;  %v4552_v39 = vld [vmem:[#allocation105_spill] sm:$0xff] }
  0xc3   :  { %788 = vmatmul.mubr.f32.gmra.mrb[34].mxu1 %v4545_v47 }
  0xc4   :  { %792 = vmatprep.mubr.f32.mxu1 %v4546_v40  ;;  %v949_v40 = vld [vmem:[%s4179_s4 + $0x88] sm:$0xff] }
  0xc5   :  { %467 = vmatmul.mubr.f32.gmra.mrb[34].mxu0 %v4544_v31  ;;  %1493 = vadd.xlane.f32.xlu1 %v2981_v44  ;;  %v934_v44 = vld [vmem:[%s4179_s4 + $0x10] sm:$0xff]  ;;  %982 = vst.msk [vmem:[%s4183_s8 + $0x88] sm:$0xff] %vm964_vm0, %v949_v40 }
  0xc6   :  { %471 = vmatprep.mubr.f32.mxu0 %v4547_v0  ;;  %1490 = vadd.xlane.f32.xlu0 %v2987_v43  ;;  %v932_v43 = vld [vmem:[%s4179_s4] sm:$0xff]  ;;  %967 = vst.msk [vmem:[%s4183_s8 + $0x10] sm:$0xff] %vm964_vm0, %v934_v44  ;;  %v4584_v44 = vld [vmem:[#allocation151_spill] sm:$0xff]  ;;  %v1360_v22 = vld [vmem:[%s4184_s9 + $0xd8] sm:$0xff] }
  0xc7   :  { %793 = vmatmul.mubr.f32.gmra.mrb[36].mxu1 %v4549_v55  ;;  %965 = vst.msk [vmem:[%s4183_s8] sm:$0xff] %vm964_vm0, %v932_v43  ;;  %v948_v0 = vld [vmem:[%s4179_s4 + $0x80] sm:$0xff] }
  0xc8   :  { %797 = vmatprep.mubr.f32.mxu1 %v4550_v57  ;;  %981 = vst.msk [vmem:[%s4183_s8 + $0x80] sm:$0xff] %vm964_vm0, %v948_v0  ;;  %v963_v0 = vld [vmem:[%s4179_s4 + $0xf8] sm:$0xff] }
  0xc9   :  { %472 = vmatmul.mubr.f32.gmra.mrb[36].mxu0 %v4548_v16  ;;  %1499 = vadd.xlane.f32.xlu1 %v2991_v28  ;;  %v4556_v28 = vld [vmem:[#allocation111_spill] sm:$0xff]  ;;  %996 = vst.msk [vmem:[%s4183_s8 + $0xf8] sm:$0xff] %vm964_vm0, %v963_v0  ;;  %v1012_v0 = vld [vmem:[%s4180_s5 + $0x78] sm:$0xff] }
  0xca   :  { %476 = vmatprep.mubr.f32.mxu0 %v4551_v35  ;;  %1496 = vadd.xlane.f32.xlu0 %v2995_v63  ;;  %v4557_v63 = vld [vmem:[#allocation113_spill] sm:$0xff]  ;;  %v1180_v2 = vpop.xlane.xlu1 %1179  ;;  %v4582_v16 = vld [vmem:[#allocation147_spill] sm:$0xff]  ;;  %1044 = vst.msk [vmem:[%s4184_s9 + $0x78] sm:$0xff] %vm964_vm0, %v1012_v0 }
  0xcb   :  { %798 = vmatmul.mubr.f32.gmra.mrb[38].mxu1 %v4553_v54  ;;  %v950_v54 = vld [vmem:[%s4179_s4 + $0x90] sm:$0xff]  ;;  %v1028_v0 = vld [vmem:[%s4180_s5 + $0xf8] sm:$0xff] }
  0xcc   :  { %802 = vmatprep.mubr.f32.mxu1 %v4554_v4  ;;  %983 = vst.msk [vmem:[%s4183_s8 + $0x90] sm:$0xff] %vm964_vm0, %v950_v54  ;;  %v998_v54 = vld [vmem:[%s4180_s5 + $0x8] sm:$0xff]  ;;  %1060 = vst.msk [vmem:[%s4184_s9 + $0xf8] sm:$0xff] %vm964_vm0, %v1028_v0 }
  0xcd   :  { %477 = vmatmul.mubr.f32.gmra.mrb[38].mxu0 %v4552_v39  ;;  %1505 = vadd.xlane.f32.xlu1 %v3001_v20  ;;  %v4560_v20 = vld [vmem:[#allocation118_spill] sm:$0xff]  ;;  %v1067_v53 = vld [vmem:[%s4183_s8 + $0x10] sm:$0xff]  ;;  %v951_v39 = vld [vmem:[%s4179_s4 + $0x98] sm:$0xff]  ;;  %1030 = vst.msk [vmem:[%s4184_s9 + $0x8] sm:$0xff] %vm964_vm0, %v998_v54 }
  0xce   :  { %481 = vmatprep.mubr.f32.mxu0 %v4555_v45  ;;  %1502 = vadd.xlane.f32.xlu0 %v3005_v10  ;;  %v4561_v10 = vld [vmem:[#allocation119_spill] sm:$0xff]  ;;  %v1270_v56 = vadd.f32 %v1180_v2, %v1067_v53  ;;  %v1065_v49 = vld [vmem:[%s4183_s8] sm:$0xff]  ;;  %984 = vst.msk [vmem:[%s4183_s8 + $0x98] sm:$0xff] %vm964_vm0, %v951_v39 }
  0xcf   :  { %803 = vmatmul.mubr.f32.gmra.mrb[40].mxu1 %v4557_v63  ;;  %v953_v63 = vld [vmem:[%s4179_s4 + $0xa8] sm:$0xff]  ;;  %v1077_v2 = vld [vmem:[%s4183_s8 + $0x60] sm:$0xff] }
  0xd0   :  { %807 = vmatprep.mubr.f32.mxu1 %v4558_v61  ;;  %1303 = vst.msk [vmem:[%s4183_s8 + $0x10] sm:$0xff] %vm964_vm0, %v1270_v56  ;;  %986 = vst.msk [vmem:[%s4183_s8 + $0xa8] sm:$0xff] %vm964_vm0, %v953_v63  ;;  %v961_v56 = vld [vmem:[%s4179_s4 + $0xe8] sm:$0xff]  ;;  %v1000_v63 = vld [vmem:[%s4180_s5 + $0x18] sm:$0xff] }
  0xd1   :  { %482 = vmatmul.mubr.f32.gmra.mrb[40].mxu0 %v4556_v28  ;;  %1511 = vadd.xlane.f32.xlu1 %v3009_v51  ;;  %v936_v51 = vld [vmem:[%s4179_s4 + $0x20] sm:$0xff]  ;;  %994 = vst.msk [vmem:[%s4183_s8 + $0xe8] sm:$0xff] %vm964_vm0, %v961_v56  ;;  %1032 = vst.msk [vmem:[%s4184_s9 + $0x18] sm:$0xff] %vm964_vm0, %v1000_v63  ;;  %v1010_v56 = vld [vmem:[%s4180_s5 + $0x68] sm:$0xff] }
  0xd2   :  { %486 = vmatprep.mubr.f32.mxu0 %v4559_v13  ;;  %1508 = vadd.xlane.f32.xlu0 %v3013_v50  ;;  %969 = vst.msk [vmem:[%s4183_s8 + $0x20] sm:$0xff] %vm964_vm0, %v936_v51  ;;  %v4564_v50 = vld [vmem:[#allocation122_spill] sm:$0xff]  ;;  %v1174_v31 = vpop.xlane.xlu0 %1173  ;;  %1042 = vst.msk [vmem:[%s4184_s9 + $0x68] sm:$0xff] %vm964_vm0, %v1010_v56  ;;  %v1014_v54 = vld [vmem:[%s4180_s5 + $0x88] sm:$0xff] }
  0xd3   :  { %808 = vmatmul.mubr.f32.gmra.mrb[42].mxu1 %v4561_v10  ;;  %v1183_v47 = vpop.xlane.xlu1 %1182  ;;  %v1268_v55 = vadd.f32 %v1174_v31, %v1065_v49  ;;  %1046 = vst.msk [vmem:[%s4184_s9 + $0x88] sm:$0xff] %vm964_vm0, %v1014_v54  ;;  %v1016_v63 = vld [vmem:[%s4180_s5 + $0x98] sm:$0xff]  ;;  %v1026_v56 = vld [vmem:[%s4180_s5 + $0xe8] sm:$0xff] }
  0xd4   :  { %812 = vmatprep.mubr.f32.mxu1 %v4562_v14  ;;  %v1271_v57 = vadd.f32 %v1183_v47, %v1068_v11  ;;  %v4589_v14 = vld [vmem:[#allocation155_spill] sm:$0xff]  ;;  %v960_v11 = vld [vmem:[%s4179_s4 + $0xe0] sm:$0xff]  ;;  %1048 = vst.msk [vmem:[%s4184_s9 + $0x98] sm:$0xff] %vm964_vm0, %v1016_v63  ;;  %1058 = vst.msk [vmem:[%s4184_s9 + $0xe8] sm:$0xff] %vm964_vm0, %v1026_v56 }
  0xd5   :  { %487 = vmatmul.mubr.f32.gmra.mrb[42].mxu0 %v4560_v20  ;;  %1517 = vadd.xlane.f32.xlu1 %v3015_v18  ;;  %v938_v18 = vld [vmem:[%s4179_s4 + $0x30] sm:$0xff]  ;;  %1301 = vst.msk [vmem:[%s4183_s8] sm:$0xff] %vm964_vm0, %v1268_v55  ;;  %v1072_v20 = vld [vmem:[%s4183_s8 + $0x38] sm:$0xff]  ;;  %993 = vst.msk [vmem:[%s4183_s8 + $0xe0] sm:$0xff] %vm964_vm0, %v960_v11 }
  0xd6   :  { %491 = vmatprep.mubr.f32.mxu0 %v4563_v41  ;;  %1514 = vadd.xlane.f32.xlu0 %v3018_v17  ;;  %971 = vst.msk [vmem:[%s4183_s8 + $0x30] sm:$0xff] %vm964_vm0, %v938_v18  ;;  %v4568_v17 = vld [vmem:[#allocation129_spill] sm:$0xff]  ;;  %1304 = vst.msk [vmem:[%s4183_s8 + $0x18] sm:$0xff] %vm964_vm0, %v1271_v57  ;;  %v954_v18 = vld [vmem:[%s4179_s4 + $0xb0] sm:$0xff] }
  0xd7   :  { %813 = vmatmul.mubr.f32.gmra.mrb[44].mxu1 %v4565_v42  ;;  %v4590_v42 = vld [vmem:[#allocation156_spill] sm:$0xff]  ;;  %987 = vst.msk [vmem:[%s4183_s8 + $0xb0] sm:$0xff] %vm964_vm0, %v954_v18  ;;  %v1009_v11 = vld [vmem:[%s4180_s5 + $0x60] sm:$0xff] }
  0xd8   :  { %817 = vmatprep.mubr.f32.mxu1 %v4566_v32  ;;  %v962_v57 = vld [vmem:[%s4179_s4 + $0xf0] sm:$0xff]  ;;  %1041 = vst.msk [vmem:[%s4184_s9 + $0x60] sm:$0xff] %vm964_vm0, %v1009_v11  ;;  %v1025_v11 = vld [vmem:[%s4180_s5 + $0xe0] sm:$0xff] }
  0xd9   :  { %492 = vmatmul.mubr.f32.gmra.mrb[44].mxu0 %v4564_v50  ;;  %1523 = vadd.xlane.f32.xlu1 %v3020_v24  ;;  %v4572_v24 = vld [vmem:[#allocation135_spill] sm:$0xff]  ;;  %v1069_v4 = vld [vmem:[%s4183_s8 + $0x20] sm:$0xff]  ;;  %v955_v50 = vld [vmem:[%s4179_s4 + $0xb8] sm:$0xff]  ;;  %995 = vst.msk [vmem:[%s4183_s8 + $0xf0] sm:$0xff] %vm964_vm0, %v962_v57 }
  0xda   :  { %496 = vmatprep.mubr.f32.mxu0 %v4567_v23  ;;  %1520 = vadd.xlane.f32.xlu0 %v3028_v29  ;;  %v4573_v29 = vld [vmem:[#allocation136_spill] sm:$0xff]  ;;  %v1177_v35 = vpop.xlane.xlu0 %1176  ;;  %988 = vst.msk [vmem:[%s4183_s8 + $0xb8] sm:$0xff] %vm964_vm0, %v955_v50  ;;  %1057 = vst.msk [vmem:[%s4184_s9 + $0xe0] sm:$0xff] %vm964_vm0, %v1025_v11 }
  0xdb   :  { %818 = vmatmul.mubr.f32.gmra.mrb[46].mxu1 %v4569_v59  ;;  %v1073_v59 = vld [vmem:[%s4183_s8 + $0x40] sm:$0xff]  ;;  %v1011_v57 = vld [vmem:[%s4180_s5 + $0x70] sm:$0xff] }
  0xdc   :  { %822 = vmatprep.mubr.f32.mxu1 %v4570_v34  ;;  %1043 = vst.msk [vmem:[%s4184_s9 + $0x70] sm:$0xff] %vm964_vm0, %v1011_v57  ;;  %v1027_v57 = vld [vmem:[%s4180_s5 + $0xf0] sm:$0xff] }
  0xdd   :  { %497 = vmatmul.mubr.f32.gmra.mrb[46].mxu0 %v4568_v17  ;;  %v1071_v10 = vld [vmem:[%s4183_s8 + $0x30] sm:$0xff]  ;;  %v1074_v17 = vld [vmem:[%s4183_s8 + $0x48] sm:$0xff]  ;;  %1059 = vst.msk [vmem:[%s4184_s9 + $0xf0] sm:$0xff] %vm964_vm0, %v1027_v57 }
  0xde   :  { %501 = vmatprep.mubr.f32.mxu0 %v4571_v1 }
  0xdf   :  { %823 = vmatmul.mubr.f32.gmra.mrb[48].mxu1 %v4573_v29  ;;  %v1189_v45 = vpop.xlane.xlu1 %1188  ;;  %v1186_v28 = vpop.xlane.xlu0 %1185  ;;  %v956_v29 = vld [vmem:[%s4179_s4 + $0xc0] sm:$0xff] }
  0xe0   :  { %827 = vmatprep.mubr.f32.mxu1 %v4574_v48  ;;  %v1272_v13 = vadd.f32 %v1186_v28, %v1069_v4  ;;  %989 = vst.msk [vmem:[%s4183_s8 + $0xc0] sm:$0xff] %vm964_vm0, %v956_v29  ;;  %v1076_v48 = vld [vmem:[%s4183_s8 + $0x58] sm:$0xff]  ;;  %v1005_v29 = vld [vmem:[%s4180_s5 + $0x40] sm:$0xff] }
  0xe1   :  { %502 = vmatmul.mubr.f32.gmra.mrb[48].mxu0 %v4572_v24  ;;  %v957_v24 = vld [vmem:[%s4179_s4 + $0xc8] sm:$0xff]  ;;  %v1084_v4 = vld [vmem:[%s4183_s8 + $0x98] sm:$0xff]  ;;  %1037 = vst.msk [vmem:[%s4184_s9 + $0x40] sm:$0xff] %vm964_vm0, %v1005_v29  ;;  %v1021_v29 = vld [vmem:[%s4180_s5 + $0xc0] sm:$0xff] }
  0xe2   :  { %506 = vmatprep.mubr.f32.mxu0 %v4575_v9  ;;  %1305 = vst.msk [vmem:[%s4183_s8 + $0x20] sm:$0xff] %vm964_vm0, %v1272_v13  ;;  %990 = vst.msk [vmem:[%s4183_s8 + $0xc8] sm:$0xff] %vm964_vm0, %v957_v24  ;;  %v1075_v9 = vld [vmem:[%s4183_s8 + $0x50] sm:$0xff]  ;;  %v1086_v13 = vld [vmem:[%s4183_s8 + $0xa8] sm:$0xff] }
  0xe3   :  { %828 = vmatmul.mubr.f32.gmra.mrb[50].mxu1 %v4577_v30  ;;  %v1088_v50 = vld [vmem:[%s4183_s8 + $0xb8] sm:$0xff]  ;;  %v1006_v24 = vld [vmem:[%s4180_s5 + $0x48] sm:$0xff]  ;;  %1053 = vst.msk [vmem:[%s4184_s9 + $0xc0] sm:$0xff] %vm964_vm0, %v1021_v29  ;;  %v1361_v11 = vld [vmem:[%s4184_s9 + $0xe0] sm:$0xff] }
  0xe4   :  { %832 = vmatprep.mubr.f32.mxu1 %v4578_v21  ;;  %v958_v21 = vld [vmem:[%s4179_s4 + $0xd0] sm:$0xff]  ;;  %1038 = vst.msk [vmem:[%s4184_s9 + $0x48] sm:$0xff] %vm964_vm0, %v1006_v24  ;;  %v1022_v24 = vld [vmem:[%s4180_s5 + $0xc8] sm:$0xff] }
  0xe5   :  { %507 = vmatmul.mubr.f32.gmra.mrb[50].mxu0 %v4576_v15  ;;  %991 = vst.msk [vmem:[%s4183_s8 + $0xd0] sm:$0xff] %vm964_vm0, %v958_v21  ;;  %v1007_v21 = vld [vmem:[%s4180_s5 + $0x50] sm:$0xff]  ;;  %1054 = vst.msk [vmem:[%s4184_s9 + $0xc8] sm:$0xff] %vm964_vm0, %v1022_v24 }
  0xe6   :  { %511 = vmatprep.mubr.f32.mxu0 %v3037_v46  ;;  %v4579_v46 = vld [vmem:[#allocation144_spill] sm:$0xff]  ;;  %1039 = vst.msk [vmem:[%s4184_s9 + $0x50] sm:$0xff] %vm964_vm0, %v1007_v21 }
  0xe7   :  { %833 = vmatmul.mubr.f32.gmra.mrb[52].mxu1 %v4579_v46  ;;  %v1195_v41 = vpop.xlane.xlu1 %1194  ;;  %v1078_v46 = vld [vmem:[%s4183_s8 + $0x68] sm:$0xff]  ;;  %v1023_v21 = vld [vmem:[%s4180_s5 + $0xd0] sm:$0xff] }
  0xe8   :  { %837 = vmatprep.mubr.f32.mxu1 %v4580_v27  ;;  %v1192_v51 = vpop.xlane.xlu0 %1191  ;;  %v1275_v32 = vadd.f32 %v1195_v41, %v1072_v20  ;;  %1055 = vst.msk [vmem:[%s4184_s9 + $0xd0] sm:$0xff] %vm964_vm0, %v1023_v21 }
  0xe9   :  { %512 = vmatmul.mubr.f32.gmra.mrb[52].mxu0 %v3042_v58  ;;  %v946_v58 = vld [vmem:[%s4179_s4 + $0x70] sm:$0xff]  ;;  %v1274_v23 = vadd.f32 %v1192_v51, %v1071_v10  ;;  %v1001_v51 = vld [vmem:[%s4180_s5 + $0x20] sm:$0xff] }
  0xea   :  { %516 = vmatprep.mubr.f32.mxu0 %v3047_v25  ;;  %979 = vst.msk [vmem:[%s4183_s8 + $0x70] sm:$0xff] %vm964_vm0, %v946_v58  ;;  %v4581_v25 = vld [vmem:[#allocation146_spill] sm:$0xff]  ;;  %1308 = vst.msk [vmem:[%s4183_s8 + $0x38] sm:$0xff] %vm964_vm0, %v1275_v32 }
  0xeb   :  { %838 = vmatmul.mubr.f32.gmra.mrb[54].mxu1 %v4581_v25  ;;  %1307 = vst.msk [vmem:[%s4183_s8 + $0x30] sm:$0xff] %vm964_vm0, %v1274_v23  ;;  %v1080_v25 = vld [vmem:[%s4183_s8 + $0x78] sm:$0xff]  ;;  %1033 = vst.msk [vmem:[%s4184_s9 + $0x20] sm:$0xff] %vm964_vm0, %v1001_v51  ;;  %v1017_v51 = vld [vmem:[%s4180_s5 + $0xa0] sm:$0xff] }
  0xec   :  { %842 = vmatprep.mubr.f32.mxu1 %v4582_v16  ;;  %v1004_v23 = vld [vmem:[%s4180_s5 + $0x38] sm:$0xff]  ;;  %1049 = vst.msk [vmem:[%s4184_s9 + $0xa0] sm:$0xff] %vm964_vm0, %v1017_v51 }
  0xed   :  { %517 = vmatmul.mubr.f32.gmra.mrb[54].mxu0 %v3058_v19  ;;  %v1066_v19 = vld [vmem:[%s4183_s8 + $0x8] sm:$0xff]  ;;  %1036 = vst.msk [vmem:[%s4184_s9 + $0x38] sm:$0xff] %vm964_vm0, %v1004_v23  ;;  %v1020_v23 = vld [vmem:[%s4180_s5 + $0xb8] sm:$0xff] }
  0xee   :  { %521 = vmatprep.mubr.f32.mxu0 %v3073_v62  ;;  %v4583_v62 = vld [vmem:[#allocation150_spill] sm:$0xff]  ;;  %v1269_v43 = vadd.f32 %v1177_v35, %v1066_v19  ;;  %v1082_v19 = vld [vmem:[%s4183_s8 + $0x88] sm:$0xff]  ;;  %1052 = vst.msk [vmem:[%s4184_s9 + $0xb8] sm:$0xff] %vm964_vm0, %v1020_v23 }
  0xef   :  { %843 = vmatmul.mubr.f32.gmra.mrb[56].mxu1 %v4583_v62  ;;  %v1201_v34 = vpop.xlane.xlu1 %1200  ;;  %v1081_v62 = vld [vmem:[%s4183_s8 + $0x80] sm:$0xff]  ;;  %v1359_v21 = vld [vmem:[%s4184_s9 + $0xd0] sm:$0xff] }
  0xf0   :  { %847 = vmatprep.mubr.f32.mxu1 %v4584_v44  ;;  %1302 = vst.msk [vmem:[%s4183_s8 + $0x8] sm:$0xff] %vm964_vm0, %v1269_v43  ;;  %v1198_v1 = vpop.xlane.xlu0 %1197  ;;  %v1277_v7 = vadd.f32 %v1201_v34, %v1074_v17  ;;  %v997_v44 = vld [vmem:[%s4180_s5] sm:$0xff] }
  0xf1   :  { %522 = vmatmul.mubr.f32.gmra.mrb[56].mxu0 %v3078_v37  ;;  %v1070_v37 = vld [vmem:[%s4183_s8 + $0x28] sm:$0xff]  ;;  %v1276_v8 = vadd.f32 %v1198_v1, %v1073_v59  ;;  %v1079_v31 = vld [vmem:[%s4183_s8 + $0x70] sm:$0xff]  ;;  %1029 = vst.msk [vmem:[%s4184_s9] sm:$0xff] %vm964_vm0, %v997_v44  ;;  %v1013_v44 = vld [vmem:[%s4180_s5 + $0x80] sm:$0xff] }
  0xf2   :  { %526 = vmatprep.mubr.f32.mxu0 %v3083_v12  ;;  %v4585_v12 = vld [vmem:[#allocation153_spill] sm:$0xff]  ;;  %v1273_v61 = vadd.f32 %v1189_v45, %v1070_v37  ;;  %1310 = vst.msk [vmem:[%s4183_s8 + $0x48] sm:$0xff] %vm964_vm0, %v1277_v7  ;;  %v1003_v59 = vld [vmem:[%s4180_s5 + $0x30] sm:$0xff]  ;;  %1045 = vst.msk [vmem:[%s4184_s9 + $0x80] sm:$0xff] %vm964_vm0, %v1013_v44 }
  0xf3   :  { %848 = vmatmul.mubr.f32.gmra.mrb[58].mxu1 %v4585_v12  ;;  %1309 = vst.msk [vmem:[%s4183_s8 + $0x40] sm:$0xff] %vm964_vm0, %v1276_v8  ;;  %v1083_v12 = vld [vmem:[%s4183_s8 + $0x90] sm:$0xff]  ;;  %1035 = vst.msk [vmem:[%s4184_s9 + $0x30] sm:$0xff] %vm964_vm0, %v1003_v59 }
  0xf4   :  { %852 = vmatprep.mubr.f32.mxu1 %v4586_v33  ;;  %1306 = vst.msk [vmem:[%s4183_s8 + $0x28] sm:$0xff] %vm964_vm0, %v1273_v61  ;;  %v999_v33 = vld [vmem:[%s4180_s5 + $0x10] sm:$0xff] }
  0xf5   :  { %527 = vmatmul.mubr.f32.gmra.mrb[58].mxu0 %v3094_v60  ;;  %v952_v60 = vld [vmem:[%s4179_s4 + $0xa0] sm:$0xff]  ;;  %1031 = vst.msk [vmem:[%s4184_s9 + $0x10] sm:$0xff] %vm964_vm0, %v999_v33  ;;  %v1015_v33 = vld [vmem:[%s4180_s5 + $0x90] sm:$0xff] }
  0xf6   :  { %531 = vmatprep.mubr.f32.mxu0 %v4587_v3  ;;  %985 = vst.msk [vmem:[%s4183_s8 + $0xa0] sm:$0xff] %vm964_vm0, %v952_v60  ;;  %1047 = vst.msk [vmem:[%s4184_s9 + $0x90] sm:$0xff] %vm964_vm0, %v1015_v33  ;;  %v1019_v59 = vld [vmem:[%s4180_s5 + $0xb0] sm:$0xff] }
  0xf7   :  { %853 = vmatmul.mubr.f32.gmra.mrb[60].mxu1 %v4589_v14  ;;  %v1207_v15 = vpop.xlane.xlu1 %1206  ;;  %1051 = vst.msk [vmem:[%s4184_s9 + $0xb0] sm:$0xff] %vm964_vm0, %v1019_v59 }
  0xf8   :  { %857 = vmatprep.mubr.f32.mxu1 %v4590_v42  ;;  %v1204_v30 = vpop.xlane.xlu0 %1203  ;;  %v1279_v38 = vadd.f32 %v1207_v15, %v1076_v48  ;;  %v1087_v42 = vld [vmem:[%s4183_s8 + $0xb0] sm:$0xff]  ;;  %v1092_v48 = vld [vmem:[%s4183_s8 + $0xd8] sm:$0xff] }
  0xf9   :  { %532 = vmatmul.mubr.f32.gmra.mrb[60].mxu0 %v4588_v52  ;;  %v1278_v53 = vadd.f32 %v1204_v30, %v1075_v9  ;;  %v1002_v52 = vld [vmem:[%s4180_s5 + $0x28] sm:$0xff]  ;;  %v1091_v9 = vld [vmem:[%s4183_s8 + $0xd0] sm:$0xff] }
  0xfa   :  { %536 = vmatprep.mubr.f32.mxu0 %v4591_v5  ;;  %1312 = vst.msk [vmem:[%s4183_s8 + $0x58] sm:$0xff] %vm964_vm0, %v1279_v38  ;;  %1034 = vst.msk [vmem:[%s4184_s9 + $0x28] sm:$0xff] %vm964_vm0, %v1002_v52  ;;  %v1018_v52 = vld [vmem:[%s4180_s5 + $0xa8] sm:$0xff] }
  0xfb   :  { %858 = vmatmul.mubr.f32.gmra.mrb[62].mxu1 %v4593_v6  ;;  %1311 = vst.msk [vmem:[%s4183_s8 + $0x50] sm:$0xff] %vm964_vm0, %v1278_v53  ;;  %v1213_v26 = vpop.xlane.xlu1 %1212  ;;  %v1089_v6 = vld [vmem:[%s4183_s8 + $0xc0] sm:$0xff]  ;;  %1050 = vst.msk [vmem:[%s4184_s9 + $0xa8] sm:$0xff] %vm964_vm0, %v1018_v52 }
  0xfc   :  { %v1281_v58 = vadd.f32 %v1213_v26, %v1078_v46  ;;  %v1094_v46 = vld [vmem:[%s4183_s8 + $0xe8] sm:$0xff] }
  0xfd   :  { %537 = vmatmul.mubr.f32.gmra.mrb[62].mxu0 %v4592_v36  ;;  %v1085_v60 = vld [vmem:[%s4183_s8 + $0xa0] sm:$0xff]  ;;  %v1090_v36 = vld [vmem:[%s4183_s8 + $0xc8] sm:$0xff] }
  0xfe   :  { %v1210_v27 = vpop.xlane.xlu0 %1209  ;;  %1314 = vst.msk [vmem:[%s4183_s8 + $0x68] sm:$0xff] %vm964_vm0, %v1281_v58 }
  0xff   :  { %v1280_v49 = vadd.f32 %v1210_v27, %v1077_v2  ;;  %v1219_v47 = vpop.xlane.xlu1 %1218  ;;  %v1093_v2 = vld [vmem:[%s4183_s8 + $0xe0] sm:$0xff] }
 0x100   :  { %v1283_v16 = vadd.f32 %v1219_v47, %v1080_v25  ;;  %v1096_v25 = vld [vmem:[%s4183_s8 + $0xf8] sm:$0xff] }
 0x101   :  { %1313 = vst.msk [vmem:[%s4183_s8 + $0x60] sm:$0xff] %vm964_vm0, %v1280_v49 }
 0x102   :  { %v1216_v40 = vpop.xlane.xlu0 %1215  ;;  %1316 = vst.msk [vmem:[%s4183_s8 + $0x78] sm:$0xff] %vm964_vm0, %v1283_v16 }
 0x103   :  { %v1282_v55 = vadd.f32 %v1216_v40, %v1079_v31  ;;  %v1225_v35 = vpop.xlane.xlu1 %1224  ;;  %v1095_v31 = vld [vmem:[%s4183_s8 + $0xf0] sm:$0xff] }
 0x104   :  { %v1285_v43 = vadd.f32 %v1225_v35, %v1082_v19  ;;  %v1334_v19 = vld [vmem:[%s4184_s9 + $0x8] sm:$0xff] }
 0x105   :  { %1315 = vst.msk [vmem:[%s4183_s8 + $0x70] sm:$0xff] %vm964_vm0, %v1282_v55 }
 0x106   :  { %v1222_v39 = vpop.xlane.xlu0 %1221  ;;  %1318 = vst.msk [vmem:[%s4183_s8 + $0x88] sm:$0xff] %vm964_vm0, %v1285_v43 }
 0x107   :  { %v1284_v37 = vadd.f32 %v1222_v39, %v1081_v62  ;;  %v1231_v45 = vpop.xlane.xlu1 %1230  ;;  %v1333_v62 = vld [vmem:[%s4184_s9] sm:$0xff] }
 0x108   :  { %v1287_v3 = vadd.f32 %v1231_v45, %v1084_v4  ;;  %v1336_v4 = vld [vmem:[%s4184_s9 + $0x18] sm:$0xff] }
 0x109   :  { %1317 = vst.msk [vmem:[%s4183_s8 + $0x80] sm:$0xff] %vm964_vm0, %v1284_v37 }
 0x10a   :  { %1320 = vst.msk [vmem:[%s4183_s8 + $0x98] sm:$0xff] %vm964_vm0, %v1287_v3 }
 0x10b   :  { %v1228_v28 = vpop.xlane.xlu0 %1227 }
 0x10c   :  { %v1286_v61 = vadd.f32 %v1228_v28, %v1083_v12  ;;  %v1335_v12 = vld [vmem:[%s4184_s9 + $0x10] sm:$0xff] }
 0x10d   :  { %v1237_v20 = vpop.xlane.xlu1 %1236 }
 0x10e   :  { %1319 = vst.msk [vmem:[%s4183_s8 + $0x90] sm:$0xff] %vm964_vm0, %v1286_v61  ;;  %v1289_v14 = vadd.f32 %v1237_v20, %v1086_v13  ;;  %v1338_v13 = vld [vmem:[%s4184_s9 + $0x28] sm:$0xff] }
 0x110   :  { %v1234_v10 = vpop.xlane.xlu0 %1233  ;;  %1322 = vst.msk [vmem:[%s4183_s8 + $0xa8] sm:$0xff] %vm964_vm0, %v1289_v14 }
 0x111   :  { %v1288_v41 = vadd.f32 %v1234_v10, %v1085_v60  ;;  %v1337_v60 = vld [vmem:[%s4184_s9 + $0x20] sm:$0xff] }
 0x113   :  { %1321 = vst.msk [vmem:[%s4183_s8 + $0xa0] sm:$0xff] %vm964_vm0, %v1288_v41 }
 0x116   :  { %v1243_v5 = vpop.xlane.xlu1 %1242 }
 0x117   :  { %v1240_v32 = vpop.xlane.xlu0 %1239  ;;  %v1291_v18 = vadd.f32 %v1243_v5, %v1088_v50  ;;  %v1340_v50 = vld [vmem:[%s4184_s9 + $0x38] sm:$0xff] }
 0x118   :  { %v1290_v17 = vadd.f32 %v1240_v32, %v1087_v42  ;;  %v1339_v42 = vld [vmem:[%s4184_s9 + $0x30] sm:$0xff] }
 0x119   :  { %1324 = vst.msk [vmem:[%s4183_s8 + $0xb8] sm:$0xff] %vm964_vm0, %v1291_v18 }
 0x11a   :  { %1323 = vst.msk [vmem:[%s4183_s8 + $0xb0] sm:$0xff] %vm964_vm0, %v1290_v17  ;;  %v1249_v34 = vpop.xlane.xlu1 %1248 }
 0x11b   :  { %v1246_v1 = vpop.xlane.xlu0 %1245  ;;  %v1293_v7 = vadd.f32 %v1249_v34, %v1090_v36  ;;  %v1342_v36 = vld [vmem:[%s4184_s9 + $0x48] sm:$0xff] }
 0x11c   :  { %v1292_v8 = vadd.f32 %v1246_v1, %v1089_v6  ;;  %v1341_v6 = vld [vmem:[%s4184_s9 + $0x40] sm:$0xff] }
 0x11d   :  { %1326 = vst.msk [vmem:[%s4183_s8 + $0xc8] sm:$0xff] %vm964_vm0, %v1293_v7 }
 0x11e   :  { %1325 = vst.msk [vmem:[%s4183_s8 + $0xc0] sm:$0xff] %vm964_vm0, %v1292_v8  ;;  %v1255_v15 = vpop.xlane.xlu1 %1254 }
 0x11f   :  { %v1252_v30 = vpop.xlane.xlu0 %1251  ;;  %v1295_v38 = vadd.f32 %v1255_v15, %v1092_v48  ;;  %v1344_v48 = vld [vmem:[%s4184_s9 + $0x58] sm:$0xff] }
 0x120   :  { %v1294_v53 = vadd.f32 %v1252_v30, %v1091_v9  ;;  %v1343_v9 = vld [vmem:[%s4184_s9 + $0x50] sm:$0xff] }
 0x121   :  { %1328 = vst.msk [vmem:[%s4183_s8 + $0xd8] sm:$0xff] %vm964_vm0, %v1295_v38 }
 0x122   :  { %1327 = vst.msk [vmem:[%s4183_s8 + $0xd0] sm:$0xff] %vm964_vm0, %v1294_v53  ;;  %v1261_v26 = vpop.xlane.xlu1 %1260 }
 0x123   :  { %v1258_v27 = vpop.xlane.xlu0 %1257  ;;  %v1297_v58 = vadd.f32 %v1261_v26, %v1094_v46  ;;  %v1346_v46 = vld [vmem:[%s4184_s9 + $0x68] sm:$0xff] }
 0x124   :  { %v1296_v49 = vadd.f32 %v1258_v27, %v1093_v2  ;;  %v1345_v2 = vld [vmem:[%s4184_s9 + $0x60] sm:$0xff] }
 0x125   :  { %1330 = vst.msk [vmem:[%s4183_s8 + $0xe8] sm:$0xff] %vm964_vm0, %v1297_v58 }
 0x126   :  { %1329 = vst.msk [vmem:[%s4183_s8 + $0xe0] sm:$0xff] %vm964_vm0, %v1296_v49  ;;  %v1267_v47 = vpop.xlane.xlu1 %1266 }
 0x127   :  { %v1264_v40 = vpop.xlane.xlu0 %1263  ;;  %v1299_v16 = vadd.f32 %v1267_v47, %v1096_v25  ;;  %v1348_v25 = vld [vmem:[%s4184_s9 + $0x78] sm:$0xff] }
 0x128   :  { %v1298_v55 = vadd.f32 %v1264_v40, %v1095_v31  ;;  %v1347_v31 = vld [vmem:[%s4184_s9 + $0x70] sm:$0xff] }
 0x129   :  { %1332 = vst.msk [vmem:[%s4183_s8 + $0xf8] sm:$0xff] %vm964_vm0, %v1299_v16 }
 0x12a   :  { %1331 = vst.msk [vmem:[%s4183_s8 + $0xf0] sm:$0xff] %vm964_vm0, %v1298_v55  ;;  %v1434_v35 = vpop.xlane.xlu1 %1433 }
 0x12b   :  { %v1431_v39 = vpop.xlane.xlu0 %1430  ;;  %v1526_v43 = vadd.f32 %v1434_v35, %v1334_v19  ;;  %v1350_v19 = vld [vmem:[%s4184_s9 + $0x88] sm:$0xff] }
 0x12c   :  { %v1525_v37 = vadd.f32 %v1431_v39, %v1333_v62  ;;  %v1349_v62 = vld [vmem:[%s4184_s9 + $0x80] sm:$0xff] }
 0x12d   :  { %1558 = vst.msk [vmem:[%s4184_s9 + $0x8] sm:$0xff] %vm964_vm0, %v1526_v43  ;;  %v1352_v43 = vld [vmem:[%s4184_s9 + $0x98] sm:$0xff] }
 0x12e   :  { %1557 = vst.msk [vmem:[%s4184_s9] sm:$0xff] %vm964_vm0, %v1525_v37  ;;  %v1440_v45 = vpop.xlane.xlu1 %1439  ;;  %v1351_v37 = vld [vmem:[%s4184_s9 + $0x90] sm:$0xff] }
 0x12f   :  { %v1437_v28 = vpop.xlane.xlu0 %1436  ;;  %v1528_v3 = vadd.f32 %v1440_v45, %v1336_v4 }
 0x130   :  { %v1527_v61 = vadd.f32 %v1437_v28, %v1335_v12 }
 0x131   :  { %1560 = vst.msk [vmem:[%s4184_s9 + $0x18] sm:$0xff] %vm964_vm0, %v1528_v3  ;;  %v1354_v3 = vld [vmem:[%s4184_s9 + $0xa8] sm:$0xff] }
 0x132   :  { %1559 = vst.msk [vmem:[%s4184_s9 + $0x10] sm:$0xff] %vm964_vm0, %v1527_v61  ;;  %v1446_v20 = vpop.xlane.xlu1 %1445  ;;  %v1353_v61 = vld [vmem:[%s4184_s9 + $0xa0] sm:$0xff] }
 0x133   :  { %v1443_v10 = vpop.xlane.xlu0 %1442  ;;  %v1530_v14 = vadd.f32 %v1446_v20, %v1338_v13 }
 0x134   :  { %v1529_v41 = vadd.f32 %v1443_v10, %v1337_v60 }
 0x135   :  { %1562 = vst.msk [vmem:[%s4184_s9 + $0x28] sm:$0xff] %vm964_vm0, %v1530_v14 }
 0x136   :  { %1561 = vst.msk [vmem:[%s4184_s9 + $0x20] sm:$0xff] %vm964_vm0, %v1529_v41  ;;  %v1452_v5 = vpop.xlane.xlu1 %1451 }
 0x137   :  { %v1449_v32 = vpop.xlane.xlu0 %1448  ;;  %v1532_v18 = vadd.f32 %v1452_v5, %v1340_v50  ;;  %v1356_v50 = vld [vmem:[%s4184_s9 + $0xb8] sm:$0xff] }
 0x138   :  { %v1531_v17 = vadd.f32 %v1449_v32, %v1339_v42  ;;  %v1355_v42 = vld [vmem:[%s4184_s9 + $0xb0] sm:$0xff] }
 0x139   :  { %1564 = vst.msk [vmem:[%s4184_s9 + $0x38] sm:$0xff] %vm964_vm0, %v1532_v18 }
 0x13a   :  { %1563 = vst.msk [vmem:[%s4184_s9 + $0x30] sm:$0xff] %vm964_vm0, %v1531_v17  ;;  %v1458_v34 = vpop.xlane.xlu1 %1457 }
 0x13b   :  { %v1455_v1 = vpop.xlane.xlu0 %1454  ;;  %v1534_v7 = vadd.f32 %v1458_v34, %v1342_v36  ;;  %v1358_v34 = vld [vmem:[%s4184_s9 + $0xc8] sm:$0xff] }
 0x13c   :  { %v1533_v8 = vadd.f32 %v1455_v1, %v1341_v6  ;;  %v1357_v1 = vld [vmem:[%s4184_s9 + $0xc0] sm:$0xff] }
 0x13d   :  { %1566 = vst.msk [vmem:[%s4184_s9 + $0x48] sm:$0xff] %vm964_vm0, %v1534_v7  ;;  %v383_v63 = vpop.f32.mrb[0].mxu0 }
 0x13e   :  { %1565 = vst.msk [vmem:[%s4184_s9 + $0x40] sm:$0xff] %vm964_vm0, %v1533_v8  ;;  %v1464_v15 = vpop.xlane.xlu1 %1463  ;;  %v704_v33 = vpop.f32.mrb[0].mxu1  ;;  %574 = vst [vmem:[#allocation7] sm:$0xff] %v383_v63 }
 0x13f   :  { %v1461_v30 = vpop.xlane.xlu0 %1460  ;;  %v1536_v38 = vadd.f32 %v1464_v15, %v1344_v48  ;;  %v706_v13 = vpop.f32.mrb[1].mxu1  ;;  %895 = vst [vmem:[#allocation8] sm:$0xff] %v704_v33 }
 0x140   :  { %v1535_v53 = vadd.f32 %v1461_v30, %v1343_v9  ;;  %v385_v60 = vpop.f32.mrb[1].mxu0 }
 0x141   :  { %1568 = vst.msk [vmem:[%s4184_s9 + $0x58] sm:$0xff] %vm964_vm0, %v1536_v38 }
 0x142   :  { %1567 = vst.msk [vmem:[%s4184_s9 + $0x50] sm:$0xff] %vm964_vm0, %v1535_v53  ;;  %v1470_v26 = vpop.xlane.xlu1 %1469 }
 0x143   :  { %v1467_v27 = vpop.xlane.xlu0 %1466  ;;  %v1538_v58 = vadd.f32 %v1470_v26, %v1346_v46 }
 0x144   :  { %v1537_v49 = vadd.f32 %v1467_v27, %v1345_v2 }
 0x145   :  { %1570 = vst.msk [vmem:[%s4184_s9 + $0x68] sm:$0xff] %vm964_vm0, %v1538_v58 }
 0x146   :  { %1569 = vst.msk [vmem:[%s4184_s9 + $0x60] sm:$0xff] %vm964_vm0, %v1537_v49  ;;  %v1476_v47 = vpop.xlane.xlu1 %1475  ;;  %v1362_v49 = vld [vmem:[%s4184_s9 + $0xe8] sm:$0xff] }
 0x147   :  { %v1473_v40 = vpop.xlane.xlu0 %1472  ;;  %v1540_v16 = vadd.f32 %v1476_v47, %v1348_v25 }
 0x148   :  { %v1539_v55 = vadd.f32 %v1473_v40, %v1347_v31 }
 0x149   :  { %1572 = vst.msk [vmem:[%s4184_s9 + $0x78] sm:$0xff] %vm964_vm0, %v1540_v16 }
 0x14a   :  { %1571 = vst.msk [vmem:[%s4184_s9 + $0x70] sm:$0xff] %vm964_vm0, %v1539_v55  ;;  %v1482_v35 = vpop.xlane.xlu1 %1481 }
 0x14b   :  { %v1479_v39 = vpop.xlane.xlu0 %1478  ;;  %v1542_v54 = vadd.f32 %v1482_v35, %v1350_v19  ;;  %v1364_v19 = vld [vmem:[%s4184_s9 + $0xf8] sm:$0xff] }
 0x14c   :  { %v1541_v44 = vadd.f32 %v1479_v39, %v1349_v62  ;;  %v1363_v62 = vld [vmem:[%s4184_s9 + $0xf0] sm:$0xff] }
 0x14d   :  { %1574 = vst.msk [vmem:[%s4184_s9 + $0x88] sm:$0xff] %vm964_vm0, %v1542_v54 }
 0x14e   :  { %1573 = vst.msk [vmem:[%s4184_s9 + $0x80] sm:$0xff] %vm964_vm0, %v1541_v44  ;;  %v1488_v4 = vpop.xlane.xlu1 %1487 }
 0x14f   :  { %v1485_v12 = vpop.xlane.xlu0 %1484  ;;  %v1544_v45 = vadd.f32 %v1488_v4, %v1352_v43 }
 0x150   :  { %v1543_v28 = vadd.f32 %v1485_v12, %v1351_v37 }
 0x151   :  { %1576 = vst.msk [vmem:[%s4184_s9 + $0x98] sm:$0xff] %vm964_vm0, %v1544_v45 }
 0x152   :  { %1575 = vst.msk [vmem:[%s4184_s9 + $0x90] sm:$0xff] %vm964_vm0, %v1543_v28  ;;  %v1494_v20 = vpop.xlane.xlu1 %1493 }
 0x153   :  { %v1491_v10 = vpop.xlane.xlu0 %1490  ;;  %v1546_v52 = vadd.f32 %v1494_v20, %v1354_v3 }
 0x154   :  { %v1545_v14 = vadd.f32 %v1491_v10, %v1353_v61 }
 0x155   :  { %v709_v51 = vpop.f32.mrb[2].mxu1  ;;  %1578 = vst.msk [vmem:[%s4184_s9 + $0xa8] sm:$0xff] %vm964_vm0, %v1546_v52 }
 0x156   :  { %v388_v41 = vpop.f32.mrb[2].mxu0  ;;  %v711_v5 = vpop.f32.mrb[3].mxu1  ;;  %1577 = vst.msk [vmem:[%s4184_s9 + $0xa0] sm:$0xff] %vm964_vm0, %v1545_v14  ;;  %896 = vst [vmem:[#allocation8 + $0x8] sm:$0xff] %v709_v51 }
 0x157   :  { %v390_v32 = vpop.f32.mrb[3].mxu0  ;;  %v1500_v23 = vpop.xlane.xlu1 %1499  ;;  %575 = vst [vmem:[#allocation7 + $0x8] sm:$0xff] %v388_v41 }
 0x158   :  { %v1497_v18 = vpop.xlane.xlu0 %1496  ;;  %v1548_v17 = vadd.f32 %v1500_v23, %v1356_v50 }
 0x159   :  { %v1547_v59 = vadd.f32 %v1497_v18, %v1355_v42  ;;  %v714_v6 = vpop.f32.mrb[4].mxu1 }
 0x15a   :  { %v716_v24 = vpop.f32.mrb[5].mxu1  ;;  %1580 = vst.msk [vmem:[%s4184_s9 + $0xb8] sm:$0xff] %vm964_vm0, %v1548_v17  ;;  %897 = vst [vmem:[#allocation8 + $0x10] sm:$0xff] %v714_v6 }
 0x15b   :  { %1579 = vst.msk [vmem:[%s4184_s9 + $0xb0] sm:$0xff] %vm964_vm0, %v1547_v59  ;;  %v1506_v7 = vpop.xlane.xlu1 %1505 }
 0x15c   :  { %v393_v36 = vpop.f32.mrb[4].mxu0  ;;  %v1503_v8 = vpop.xlane.xlu0 %1502  ;;  %v1550_v48 = vadd.f32 %v1506_v7, %v1358_v34 }
 0x15d   :  { %v395_v29 = vpop.f32.mrb[5].mxu0  ;;  %576 = vst [vmem:[#allocation7 + $0x10] sm:$0xff] %v393_v36  ;;  %v1549_v9 = vadd.f32 %v1503_v8, %v1357_v1 }
 0x15e   :  { %v719_v30 = vpop.f32.mrb[6].mxu1  ;;  %1582 = vst.msk [vmem:[%s4184_s9 + $0xc8] sm:$0xff] %vm964_vm0, %v1550_v48 }
 0x15f   :  { %v721_v38 = vpop.f32.mrb[7].mxu1  ;;  %1581 = vst.msk [vmem:[%s4184_s9 + $0xc0] sm:$0xff] %vm964_vm0, %v1549_v9  ;;  %v1512_v46 = vpop.xlane.xlu1 %1511  ;;  %898 = vst [vmem:[#allocation8 + $0x18] sm:$0xff] %v719_v30 }
 0x160   :  { %v398_v15 = vpop.f32.mrb[6].mxu0  ;;  %v1509_v2 = vpop.xlane.xlu0 %1508  ;;  %v1552_v26 = vadd.f32 %v1512_v46, %v1360_v22 }
 0x161   :  { %v400_v53 = vpop.f32.mrb[7].mxu0  ;;  %577 = vst [vmem:[#allocation7 + $0x18] sm:$0xff] %v398_v15  ;;  %v1551_v27 = vadd.f32 %v1509_v2, %v1359_v21 }
 0x162   :  { %v724_v58 = vpop.f32.mrb[8].mxu1  ;;  %1584 = vst.msk [vmem:[%s4184_s9 + $0xd8] sm:$0xff] %vm964_vm0, %v1552_v26 }
 0x163   :  { %v726_v25 = vpop.f32.mrb[9].mxu1  ;;  %1583 = vst.msk [vmem:[%s4184_s9 + $0xd0] sm:$0xff] %vm964_vm0, %v1551_v27  ;;  %v1518_v47 = vpop.xlane.xlu1 %1517  ;;  %899 = vst [vmem:[#allocation8 + $0x20] sm:$0xff] %v724_v58 }
 0x164   :  { %v403_v56 = vpop.f32.mrb[8].mxu0  ;;  %v1515_v40 = vpop.xlane.xlu0 %1514  ;;  %v1554_v0 = vadd.f32 %v1518_v47, %v1362_v49 }
 0x165   :  { %v405_v31 = vpop.f32.mrb[9].mxu0  ;;  %578 = vst [vmem:[#allocation7 + $0x20] sm:$0xff] %v403_v56  ;;  %v1553_v16 = vadd.f32 %v1515_v40, %v1361_v11 }
 0x166   :  { %v729_v57 = vpop.f32.mrb[10].mxu1  ;;  %1586 = vst.msk [vmem:[%s4184_s9 + $0xe8] sm:$0xff] %vm964_vm0, %v1554_v0 }
 0x167   :  { %v731_v35 = vpop.f32.mrb[11].mxu1  ;;  %1585 = vst.msk [vmem:[%s4184_s9 + $0xe0] sm:$0xff] %vm964_vm0, %v1553_v16  ;;  %v1524_v54 = vpop.xlane.xlu1 %1523  ;;  %900 = vst [vmem:[#allocation8 + $0x28] sm:$0xff] %v729_v57 }
 0x168   :  { %v408_v55 = vpop.f32.mrb[10].mxu0  ;;  %v1521_v44 = vpop.xlane.xlu0 %1520  ;;  %v1556_v43 = vadd.f32 %v1524_v54, %v1364_v19 }
 0x169   :  { %v410_v39 = vpop.f32.mrb[11].mxu0  ;;  %579 = vst [vmem:[#allocation7 + $0x28] sm:$0xff] %v408_v55  ;;  %v1555_v37 = vadd.f32 %v1521_v44, %v1363_v62 }
 0x16a   :  { %v734_v12 = vpop.f32.mrb[12].mxu1  ;;  %1588 = vst.msk [vmem:[%s4184_s9 + $0xf8] sm:$0xff] %vm964_vm0, %v1556_v43 }
 0x16b   :  { %v736_v45 = vpop.f32.mrb[13].mxu1  ;;  %1587 = vst.msk [vmem:[%s4184_s9 + $0xf0] sm:$0xff] %vm964_vm0, %v1555_v37  ;;  %901 = vst [vmem:[#allocation8 + $0x30] sm:$0xff] %v734_v12  ;;  %s1840_s9 = smov [#allocation7]  }
 0x16c   :  { %v413_v4 = vpop.f32.mrb[12].mxu0  ;;  %s1594_s16 = sshll.u32 %s1840_s9, 4  ;;  %s1595_s16 = int_to_ptr.vmem [resolvable:$true] %s1594_s16 }
 0x16d   :  { %v415_v28 = vpop.f32.mrb[13].mxu0  ;;  %580 = vst [vmem:[#allocation7 + $0x30] sm:$0xff] %v413_v4  ;;  %s1781_s18 = scalar_lea.vmem %s1595_s16, 4096  ;;  %p1786_p3 = scmp.lt.s32.totalorder %s1595_s16, %s1595_s16 }
 0x16e   :  { %v739_v33 = vpop.f32.mrb[14].mxu1  ;;  %p1782_p2 = scmp.ne.s32.totalorder %s1595_s16, %s1781_s18  ;;  %p1787_p4 = scmp.lt.s32.totalorder %s1781_s18, %s1781_s18 }
 0x16f   :  { %v741_v3 = vpop.f32.mrb[15].mxu1  ;;  %902 = vst [vmem:[#allocation8 + $0x38] sm:$0xff] %v739_v33 }
 0x170   :  { %v418_v63 = vpop.f32.mrb[14].mxu0  ;;  %p1788_p5 = por %p1787_p4, %p1786_p3 }
 0x171   :  { %v420_v61 = vpop.f32.mrb[15].mxu0  ;;  %581 = vst [vmem:[#allocation7 + $0x38] sm:$0xff] %v418_v63 }
 0x172   :  { %v744_v60 = vpop.f32.mrb[16].mxu1  ;;  %p1789_p6 = pnand %p1788_p5, %p1782_p2 }
 0x173   :  { %v746_v20 = vpop.f32.mrb[17].mxu1  ;;  %903 = vst [vmem:[#allocation8 + $0x40] sm:$0xff] %v744_v60 }
 0x174   :  { %v423_v13 = vpop.f32.mrb[16].mxu0 }
 0x175   :  { %v425_v10 = vpop.f32.mrb[17].mxu0  ;;  %582 = vst [vmem:[#allocation7 + $0x40] sm:$0xff] %v423_v13 }
 0x176   :  { %v749_v14 = vpop.f32.mrb[18].mxu1 }
 0x177   :  { %v751_v41 = vpop.f32.mrb[19].mxu1  ;;  %904 = vst [vmem:[#allocation8 + $0x48] sm:$0xff] %v749_v14 }
 0x178   :  { %v428_v52 = vpop.f32.mrb[18].mxu0 }
 0x179   :  { %v430_v51 = vpop.f32.mrb[19].mxu0  ;;  %583 = vst [vmem:[#allocation7 + $0x48] sm:$0xff] %v428_v52 }
 0x17a   :  { %v754_v42 = vpop.f32.mrb[20].mxu1 }
 0x17b   :  { %v756_v5 = vpop.f32.mrb[21].mxu1  ;;  %905 = vst [vmem:[#allocation8 + $0x50] sm:$0xff] %v754_v42 }
 0x17c   :  { %v433_v50 = vpop.f32.mrb[20].mxu0 }
 0x17d   :  { %v435_v32 = vpop.f32.mrb[21].mxu0  ;;  %584 = vst [vmem:[#allocation7 + $0x50] sm:$0xff] %v433_v50 }
 0x17e   :  { %v759_v18 = vpop.f32.mrb[22].mxu1 }
 0x17f   :  { %v761_v17 = vpop.f32.mrb[23].mxu1  ;;  %906 = vst [vmem:[#allocation8 + $0x58] sm:$0xff] %v759_v18 }
 0x180   :  { %v438_v23 = vpop.f32.mrb[22].mxu0 }
 0x181   :  { %v440_v59 = vpop.f32.mrb[23].mxu0  ;;  %585 = vst [vmem:[#allocation7 + $0x58] sm:$0xff] %v438_v23 }
 0x182   :  { %v764_v6 = vpop.f32.mrb[24].mxu1 }
 0x183   :  { %v766_v34 = vpop.f32.mrb[25].mxu1  ;;  %907 = vst [vmem:[#allocation8 + $0x60] sm:$0xff] %v764_v6 }
 0x184   :  { %v443_v36 = vpop.f32.mrb[24].mxu0 }
 0x185   :  { %v445_v1 = vpop.f32.mrb[25].mxu0  ;;  %586 = vst [vmem:[#allocation7 + $0x60] sm:$0xff] %v443_v36 }
 0x186   :  { %v769_v29 = vpop.f32.mrb[26].mxu1 }
 0x187   :  { %v771_v7 = vpop.f32.mrb[27].mxu1  ;;  %908 = vst [vmem:[#allocation8 + $0x68] sm:$0xff] %v769_v29 }
 0x188   :  { %v448_v24 = vpop.f32.mrb[26].mxu0 }
 0x189   :  { %v450_v8 = vpop.f32.mrb[27].mxu0  ;;  %587 = vst [vmem:[#allocation7 + $0x68] sm:$0xff] %v448_v24 }
 0x18a   :  { %v774_v9 = vpop.f32.mrb[28].mxu1 }
 0x18b   :  { %v776_v15 = vpop.f32.mrb[29].mxu1  ;;  %909 = vst [vmem:[#allocation8 + $0x70] sm:$0xff] %v774_v9 }
 0x18c   :  { %v453_v48 = vpop.f32.mrb[28].mxu0 }
 0x18d   :  { %v455_v30 = vpop.f32.mrb[29].mxu0  ;;  %588 = vst [vmem:[#allocation7 + $0x70] sm:$0xff] %v453_v48 }
 0x18e   :  { %v779_v21 = vpop.f32.mrb[30].mxu1 }
 0x18f   :  { %v781_v38 = vpop.f32.mrb[31].mxu1  ;;  %910 = vst [vmem:[#allocation8 + $0x78] sm:$0xff] %v779_v21 }
 0x190   :  { %v458_v22 = vpop.f32.mrb[30].mxu0 }
 0x191   :  { %v460_v53 = vpop.f32.mrb[31].mxu0  ;;  %589 = vst [vmem:[#allocation7 + $0x78] sm:$0xff] %v458_v22 }
 0x192   :  { %v784_v2 = vpop.f32.mrb[32].mxu1 }
 0x193   :  { %v786_v26 = vpop.f32.mrb[33].mxu1  ;;  %911 = vst [vmem:[#allocation8 + $0x80] sm:$0xff] %v784_v2 }
 0x194   :  { %v463_v46 = vpop.f32.mrb[32].mxu0 }
 0x195   :  { %v465_v27 = vpop.f32.mrb[33].mxu0  ;;  %590 = vst [vmem:[#allocation7 + $0x80] sm:$0xff] %v463_v46 }
 0x196   :  { %v789_v58 = vpop.f32.mrb[34].mxu1 }
 0x197   :  { %v791_v49 = vpop.f32.mrb[35].mxu1  ;;  %912 = vst [vmem:[#allocation8 + $0x88] sm:$0xff] %v789_v58 }
 0x198   :  { %v468_v56 = vpop.f32.mrb[34].mxu0 }
 0x199   :  { %v470_v11 = vpop.f32.mrb[35].mxu0  ;;  %591 = vst [vmem:[#allocation7 + $0x88] sm:$0xff] %v468_v56 }
 0x19a   :  { %v794_v31 = vpop.f32.mrb[36].mxu1 }
 0x19b   :  { %v796_v47 = vpop.f32.mrb[37].mxu1  ;;  %913 = vst [vmem:[#allocation8 + $0x90] sm:$0xff] %v794_v31 }
 0x19c   :  { %v473_v25 = vpop.f32.mrb[36].mxu0 }
 0x19d   :  { %v475_v40 = vpop.f32.mrb[37].mxu0  ;;  %592 = vst [vmem:[#allocation7 + $0x90] sm:$0xff] %v473_v25 }
 0x19e   :  { %v799_v16 = vpop.f32.mrb[38].mxu1 }
 0x19f   :  { %v801_v55 = vpop.f32.mrb[39].mxu1  ;;  %914 = vst [vmem:[#allocation8 + $0x98] sm:$0xff] %v799_v16 }
 0x1a0   :  { %v478_v0 = vpop.f32.mrb[38].mxu0 }
 0x1a1   :  { %v480_v57 = vpop.f32.mrb[39].mxu0  ;;  %593 = vst [vmem:[#allocation7 + $0x98] sm:$0xff] %v478_v0 }
 0x1a2   :  { %v804_v62 = vpop.f32.mrb[40].mxu1 }
 0x1a3   :  { %v806_v35 = vpop.f32.mrb[41].mxu1  ;;  %915 = vst [vmem:[#allocation8 + $0xa0] sm:$0xff] %v804_v62 }
 0x1a4   :  { %v483_v19 = vpop.f32.mrb[40].mxu0 }
 0x1a5   :  { %v485_v39 = vpop.f32.mrb[41].mxu0  ;;  %594 = vst [vmem:[#allocation7 + $0xa0] sm:$0xff] %v483_v19 }
 0x1a6   :  { %v809_v44 = vpop.f32.mrb[42].mxu1 }
 0x1a7   :  { %v811_v43 = vpop.f32.mrb[43].mxu1  ;;  %916 = vst [vmem:[#allocation8 + $0xa8] sm:$0xff] %v809_v44 }
 0x1a8   :  { %v488_v54 = vpop.f32.mrb[42].mxu0 }
 0x1a9   :  { %v490_v37 = vpop.f32.mrb[43].mxu0  ;;  %595 = vst [vmem:[#allocation7 + $0xa8] sm:$0xff] %v488_v54 }
 0x1aa   :  { %v814_v12 = vpop.f32.mrb[44].mxu1 }
 0x1ab   :  { %v816_v45 = vpop.f32.mrb[45].mxu1  ;;  %917 = vst [vmem:[#allocation8 + $0xb0] sm:$0xff] %v814_v12 }
 0x1ac   :  { %v493_v4 = vpop.f32.mrb[44].mxu0 }
 0x1ad   :  { %v495_v28 = vpop.f32.mrb[45].mxu0  ;;  %596 = vst [vmem:[#allocation7 + $0xb0] sm:$0xff] %v493_v4 }
 0x1ae   :  { %v819_v33 = vpop.f32.mrb[46].mxu1 }
 0x1af   :  { %v821_v3 = vpop.f32.mrb[47].mxu1  ;;  %918 = vst [vmem:[#allocation8 + $0xb8] sm:$0xff] %v819_v33 }
 0x1b0   :  { %v498_v63 = vpop.f32.mrb[46].mxu0 }
 0x1b1   :  { %v500_v61 = vpop.f32.mrb[47].mxu0  ;;  %597 = vst [vmem:[#allocation7 + $0xb8] sm:$0xff] %v498_v63 }
 0x1b2   :  { %v824_v60 = vpop.f32.mrb[48].mxu1 }
 0x1b3   :  { %v826_v20 = vpop.f32.mrb[49].mxu1  ;;  %919 = vst [vmem:[#allocation8 + $0xc0] sm:$0xff] %v824_v60 }
 0x1b4   :  { %v503_v13 = vpop.f32.mrb[48].mxu0 }
 0x1b5   :  { %v505_v10 = vpop.f32.mrb[49].mxu0  ;;  %598 = vst [vmem:[#allocation7 + $0xc0] sm:$0xff] %v503_v13 }
 0x1b6   :  { %v829_v14 = vpop.f32.mrb[50].mxu1 }
 0x1b7   :  { %v831_v41 = vpop.f32.mrb[51].mxu1  ;;  %920 = vst [vmem:[#allocation8 + $0xc8] sm:$0xff] %v829_v14 }
 0x1b8   :  { %v508_v52 = vpop.f32.mrb[50].mxu0 }
 0x1b9   :  { %v510_v51 = vpop.f32.mrb[51].mxu0  ;;  %599 = vst [vmem:[#allocation7 + $0xc8] sm:$0xff] %v508_v52 }
 0x1ba   :  { %v834_v42 = vpop.f32.mrb[52].mxu1 }
 0x1bb   :  { %v836_v5 = vpop.f32.mrb[53].mxu1  ;;  %921 = vst [vmem:[#allocation8 + $0xd0] sm:$0xff] %v834_v42 }
 0x1bc   :  { %v513_v50 = vpop.f32.mrb[52].mxu0 }
 0x1bd   :  { %v515_v32 = vpop.f32.mrb[53].mxu0  ;;  %600 = vst [vmem:[#allocation7 + $0xd0] sm:$0xff] %v513_v50 }
 0x1be   :  { %v839_v18 = vpop.f32.mrb[54].mxu1 }
 0x1bf   :  { %v841_v17 = vpop.f32.mrb[55].mxu1  ;;  %922 = vst [vmem:[#allocation8 + $0xd8] sm:$0xff] %v839_v18 }
 0x1c0   :  { %v518_v23 = vpop.f32.mrb[54].mxu0 }
 0x1c1   :  { %v520_v59 = vpop.f32.mrb[55].mxu0  ;;  %601 = vst [vmem:[#allocation7 + $0xd8] sm:$0xff] %v518_v23 }
 0x1c2   :  { %v844_v6 = vpop.f32.mrb[56].mxu1 }
 0x1c3   :  { %v846_v34 = vpop.f32.mrb[57].mxu1  ;;  %923 = vst [vmem:[#allocation8 + $0xe0] sm:$0xff] %v844_v6 }
 0x1c4   :  { %v523_v36 = vpop.f32.mrb[56].mxu0 }
 0x1c5   :  { %v525_v1 = vpop.f32.mrb[57].mxu0  ;;  %602 = vst [vmem:[#allocation7 + $0xe0] sm:$0xff] %v523_v36 }
 0x1c6   :  { %v849_v29 = vpop.f32.mrb[58].mxu1 }
 0x1c7   :  { %v851_v7 = vpop.f32.mrb[59].mxu1  ;;  %924 = vst [vmem:[#allocation8 + $0xe8] sm:$0xff] %v849_v29 }
 0x1c8   :  { %v528_v24 = vpop.f32.mrb[58].mxu0 }
 0x1c9   :  { %v530_v8 = vpop.f32.mrb[59].mxu0  ;;  %603 = vst [vmem:[#allocation7 + $0xe8] sm:$0xff] %v528_v24 }
 0x1ca   :  { %v854_v9 = vpop.f32.mrb[60].mxu1 }
 0x1cb   :  { %v856_v15 = vpop.f32.mrb[61].mxu1  ;;  %925 = vst [vmem:[#allocation8 + $0xf0] sm:$0xff] %v854_v9 }
 0x1cc   :  { %v533_v48 = vpop.f32.mrb[60].mxu0 }
 0x1cd   :  { %v535_v30 = vpop.f32.mrb[61].mxu0  ;;  %604 = vst [vmem:[#allocation7 + $0xf0] sm:$0xff] %v533_v48 }
 0x1ce   :  { %v859_v21 = vpop.f32.mrb[62].mxu1 }
 0x1cf   :  { %v861_v38 = vpop.f32.mrb[63].mxu1  ;;  %926 = vst [vmem:[#allocation8 + $0xf8] sm:$0xff] %v859_v21 }
 0x1d0   :  { %v538_v22 = vpop.f32.mrb[62].mxu0 }
 0x1d1   :  { %v540_v53 = vpop.f32.mrb[63].mxu0  ;;  %605 = vst [vmem:[#allocation7 + $0xf8] sm:$0xff] %v538_v22 }
 0x1d2   :  { %1792 = shalt.err (!%p1789_p6)
}
 0x1d3   :  { %s1793_s20 = scalar_lea.hbm %s4181_s6, 4096 }
 0x1d4   :  { %p1794_p7 = scmp.ne.s32.totalorder %s4181_s6, %s1793_s20  ;;  %p1797_p8 = scmp.lt.u32.totalorder %s1793_s20, %s4181_s6 }
 0x1d6   :  { %p1799_p9 = pnand %p1797_p8, %p1794_p7 }
 0x1d8   :  { %1802 = shalt.err (!%p1799_p9)
}
 0x1d9   :  { %1600 = dma.vmem_to_hbm [thread:$0]  %s1595_s16, 4096, %s4181_s6, [#allocation4], %s1837_s1, %s1837_s1, %s1838_s10  }
 0x1da   :  { %s1803_s27 = scalar_lea.vmem %s4138_s3, 4096  ;;  %p1808_p11 = scmp.lt.s32.totalorder %s4138_s3, %s4138_s3 }
 0x1db   :  { %p1804_p10 = scmp.ne.s32.totalorder %s4138_s3, %s1803_s27  ;;  %p1809_p12 = scmp.lt.s32.totalorder %s1803_s27, %s1803_s27 }
 0x1dd   :  { %p1810_p13 = por %p1809_p12, %p1808_p11 }
 0x1df   :  { %p1811_p0 = pnand %p1810_p13, %p1804_p10 }
 0x1e1   :  { %1814 = shalt.err (!%p1811_p0)
}
 0x1e2   :  { %s1815_s5 = scalar_lea.hbm %s4182_s7, 4096 }
 0x1e3   :  { %p1816_p1 = scmp.ne.s32.totalorder %s4182_s7, %s1815_s5  ;;  %p1819_p2 = scmp.lt.u32.totalorder %s1815_s5, %s4182_s7 }
 0x1e5   :  { %p1821_p3 = pnand %p1819_p2, %p1816_p1 }
 0x1e7   :  { %1824 = shalt.err (!%p1821_p3)
}
 0x1e8   :  { %1612 = dma.vmem_to_hbm [thread:$0]  %s4138_s3, 4096, %s4182_s7, [#allocation9], %s1837_s1, %s1837_s1, %s1838_s10  }
 0x1e9   :  { %1829 = dma.done.wait [#allocation4], 4096  }
 0x1ea   :  { %1830 = vsyncadd [#allocation4], 4294963200 }
 0x1eb   :  { %1831 = dma.done.wait [#allocation9], 4096  }
 0x1ec   :  { %1832 = vsyncadd [#allocation9], 4294963200 }
 0x1ed   :  { %1627 = vsyncpa [#allocation3], 1 }
 0x1ee   :  { %1628 = vsyncpa [#allocation6], 1 }
 0x1ef   :  { %1629 = vsyncpa [#allocation4], 1 }
 0x1f0   :  { %1630 = vsyncpa [#allocation9], 1 }

</bundles_post_ra>
